<compile_context>
chip_gen: v5e
topology: v5e:2x2
jax: 0.10.0
libtpu: 0.0.40
codegen_flags: <defaults>
</compile_context>

<pallas_src>
import math
import jax
import jax.numpy as jnp
from jax.experimental import pallas as pl
from jax.experimental.pallas import tpu as pltpu

# ---------------------------------------------------------------------------
# Small synthetic RoBERTa config
# ---------------------------------------------------------------------------
VOCAB          = 100
MAX_POS        = 64
PAD_ID         = 1          # roberta pad_token_id
HIDDEN         = 32
HEADS          = 2
HEAD_DIM       = HIDDEN // HEADS
INTER          = 64
LAYERS         = 2
NUM_LABELS     = 3
NUM_LABELS_PAD = 128        # lane-dense logits; sliced back to NUM_LABELS in wrapper
LOGITS_ROWS    = 8          # (8,128) combined output tile: rows [0,B)=logits, row B=loss
LN_EPS         = 1e-5
INIT_STD       = 0.02
LANE           = 128


# ---------------------------------------------------------------------------
# Parameter slab layout: every parameter gets an 8-row-aligned block in a single
# (SLAB_ROWS, 128) f32 buffer; the kernel slices it with static offsets.
# ---------------------------------------------------------------------------
def _make_layout():
    layout = {}
    row = [0]

    def add(name, r, c):
        layout[name] = (row[0], r, c)
        row[0] += ((r + 7) // 8) * 8   # keep every block sublane(8)-aligned

    add("emb_ln_g", 1, HIDDEN)
    add("emb_ln_b", 1, HIDDEN)
    for l in range(LAYERS):
        add(f"wqkv{l}", HIDDEN, 3 * HIDDEN)
        add(f"bqkv{l}", 1, 3 * HIDDEN)
        add(f"wo{l}",   HIDDEN, HIDDEN)
        add(f"bo{l}",   1, HIDDEN)
        add(f"ln1g{l}", 1, HIDDEN)
        add(f"ln1b{l}", 1, HIDDEN)
        add(f"wi{l}",   HIDDEN, INTER)
        add(f"bi{l}",   1, INTER)
        add(f"wo2{l}",  INTER, HIDDEN)
        add(f"bo2{l}",  1, HIDDEN)
        add(f"ln2g{l}", 1, HIDDEN)
        add(f"ln2b{l}", 1, HIDDEN)
    add("cls_dense_w", HIDDEN, HIDDEN)
    add("cls_dense_b", 1, HIDDEN)
    add("cls_out_w",   HIDDEN, NUM_LABELS_PAD)
    add("cls_out_b",   1, NUM_LABELS_PAD)
    return layout, row[0]


LAYOUT, SLAB_ROWS = _make_layout()


def _layernorm(x, g, b):
    mu = jnp.mean(x, axis=-1, keepdims=True)
    var = jnp.mean((x - mu) ** 2, axis=-1, keepdims=True)
    return (x - mu) * jax.lax.rsqrt(var + LN_EPS) * g + b


def _gelu_exact(x):
    # HF "gelu": 0.5 * x * (1 + erf(x / sqrt(2)))
    return 0.5 * x * (1.0 + jax.lax.erf(x * (1.0 / math.sqrt(2.0))))


# ---------------------------------------------------------------------------
# Fused kernel: embedding LN -> 2 encoder layers -> cls head -> cross-entropy
#   emb_ref    : (B*S, H)  summed word+pos+type embeddings                (VMEM)
#   bias_ref   : (B, S)    additive attention bias (0 real / -1e9 pad)    (VMEM)
#   labels_ref : (B,)      int32 labels                                   (SMEM)
#   slab_ref   : (SLAB_ROWS, 128) packed parameters                       (VMEM)
#   hs_ref     : (LAYERS+1, B*S, H) hidden states output
#   head_ref   : (8, 128) rows [0,B)=lane-dense logits, row B lane 0 = loss
# ---------------------------------------------------------------------------
def _fused_forward_kernel(emb_ref, bias_ref, labels_ref, slab_ref, hs_ref, head_ref):
    B, S = bias_ref.shape
    BS, H = emb_ref.shape
    scale = 1.0 / math.sqrt(HEAD_DIM)

    def P(name):
        r0, nr, nc = LAYOUT[name]
        return slab_ref[r0:r0 + nr, :nc]        # static slice of the param slab

    # ---- embeddings LayerNorm (dropout is an eval-mode no-op) ----
    x = _layernorm(emb_ref[...], P("emb_ln_g"), P("emb_ln_b"))        # (B*S, H)
    hs_ref[0] = x

    # additive key mask broadcast to (B, S_q, S_k); hoisted out of the layer loop
    bias3 = jnp.broadcast_to(jnp.expand_dims(bias_ref[...], 1), (B, S, S))

    # ---- transformer encoder layers (static python loop, stays resident) ----
    for l in range(LAYERS):
        # fused QKV projection on the flattened batch
        qkv = jnp.dot(x, P(f"wqkv{l}"),
                      preferred_element_type=jnp.float32) + P(f"bqkv{l}")   # (B*S, 3H)
        qkv3 = qkv.reshape(B, S, 3 * H)
        wo_l = P(f"wo{l}")                                                   # (H, H)

        # per-head attention, batched over B; per-head output projection is
        # accumulated in registers (no VMEM scratch round-trip)
        attn_flat = jnp.zeros((BS, H), jnp.float32)
        for hh in range(HEADS):
            q0 = hh * HEAD_DIM
            k0 = H + hh * HEAD_DIM
            v0 = 2 * H + hh * HEAD_DIM
            qh = qkv3[:, :, q0:q0 + HEAD_DIM]                                # (B, S, Dh)
            kh = qkv3[:, :, k0:k0 + HEAD_DIM]
            vh = qkv3[:, :, v0:v0 + HEAD_DIM]
            scores = jnp.einsum("bqd,bkd->bqk", qh, kh,
                                preferred_element_type=jnp.float32) * scale + bias3
            probs = jax.nn.softmax(scores, axis=-1)
            ctx_h = jnp.einsum("bqk,bkd->bqd", probs, vh,
                               preferred_element_type=jnp.float32)           # (B, S, Dh)
            attn_flat = attn_flat + jnp.dot(
                ctx_h.reshape(BS, HEAD_DIM),
                wo_l[hh * HEAD_DIM:(hh + 1) * HEAD_DIM, :],
                preferred_element_type=jnp.float32)                          # (B*S, H)

        attn_out = attn_flat + P(f"bo{l}")
        h1 = _layernorm(x + attn_out, P(f"ln1g{l}"), P(f"ln1b{l}"))

        inter = _gelu_exact(
            jnp.dot(h1, P(f"wi{l}"), preferred_element_type=jnp.float32) + P(f"bi{l}"))
        ffn = jnp.dot(inter, P(f"wo2{l}"),
                      preferred_element_type=jnp.float32) + P(f"bo2{l}")
        x = _layernorm(h1 + ffn, P(f"ln2g{l}"), P(f"ln2b{l}"))
        hs_ref[l + 1] = x

    # ---- classification head: <s>-token pooling, dense+tanh, out_proj ----
    pooled = jnp.concatenate([x[b * S:b * S + 1, :] for b in range(B)], axis=0)  # (B, H)
    z = jnp.tanh(jnp.dot(pooled, P("cls_dense_w"),
                         preferred_element_type=jnp.float32) + P("cls_dense_b"))
    logits = (jnp.dot(z, P("cls_out_w"), preferred_element_type=jnp.float32)
              + P("cls_out_b"))                       # (B, 128); padded lanes = -1e30

    # ---- cross-entropy (mean over batch); labels come from SMEM ----
    m = jnp.max(logits, axis=-1, keepdims=True)
    lse = jnp.log(jnp.sum(jnp.exp(logits - m), axis=-1, keepdims=True)) + m
    logp = logits - lse                                                     # (B, 128)
    lane = jax.lax.broadcasted_iota(jnp.int32, (1, NUM_LABELS_PAD), 1)
    nll = jnp.zeros((1, 1), jnp.float32)
    for b in range(B):
        onehot_b = (lane == labels_ref[b]).astype(jnp.float32)              # (1, 128)
        nll = nll - jnp.sum(onehot_b * logp[b:b + 1, :], axis=-1, keepdims=True)
    loss_row = jnp.broadcast_to(nll * (1.0 / B), (1, NUM_LABELS_PAD))

    pad_rows = jnp.zeros((LOGITS_ROWS - B - 1, NUM_LABELS_PAD), jnp.float32)
    head_ref[...] = jnp.concatenate([logits, loss_row, pad_rows], axis=0)   # (8, 128)


def fused_forward(emb2d, bias, labels, slab):
    BS, H = emb2d.shape
    B, S = bias.shape
    assert BS == B * S and B + 1 <= LOGITS_ROWS
    out_shapes = (
        jax.ShapeDtypeStruct((LAYERS + 1, BS, H), jnp.float32),         # hidden states
        jax.ShapeDtypeStruct((LOGITS_ROWS, NUM_LABELS_PAD), jnp.float32),  # logits + loss
    )
    return pl.pallas_call(
        _fused_forward_kernel,
        out_shape=out_shapes,
        in_specs=[
            pl.BlockSpec(memory_space=pltpu.MemorySpace.VMEM),   # emb2d
            pl.BlockSpec(memory_space=pltpu.MemorySpace.VMEM),   # attention bias
            pl.BlockSpec(memory_space=pltpu.MemorySpace.SMEM),   # labels (scalars)
            pl.BlockSpec(memory_space=pltpu.MemorySpace.VMEM),   # packed param slab
        ],
        out_specs=(
            pl.BlockSpec(memory_space=pltpu.MemorySpace.VMEM),
            pl.BlockSpec(memory_space=pltpu.MemorySpace.VMEM),
        ),
    )(emb2d, bias, labels, slab)


# ---------------------------------------------------------------------------
# Parameter init (deterministic, BERT-style N(0, 0.02)); everything except the
# embedding tables is packed once into a single lane-padded slab.
# ---------------------------------------------------------------------------
def init_params(key):
    keys = iter(jax.random.split(key, 32))

    def w(shape):
        return jax.random.normal(next(keys), shape, jnp.float32) * INIT_STD

    pieces = {
        "emb_ln_g": jnp.ones((1, HIDDEN), jnp.float32),
        "emb_ln_b": jnp.zeros((1, HIDDEN), jnp.float32),
        "cls_dense_w": w((HIDDEN, HIDDEN)),
        "cls_dense_b": jnp.zeros((1, HIDDEN), jnp.float32),
    }
    cls_out_w = w((HIDDEN, NUM_LABELS))
    pieces["cls_out_w"] = (jnp.zeros((HIDDEN, NUM_LABELS_PAD), jnp.float32)
                           .at[:, :NUM_LABELS].set(cls_out_w))
    pieces["cls_out_b"] = (jnp.full((1, NUM_LABELS_PAD), -1e30, jnp.float32)
                           .at[:, :NUM_LABELS].set(0.0))
    for l in range(LAYERS):
        pieces[f"wqkv{l}"] = w((HIDDEN, 3 * HIDDEN))
        pieces[f"bqkv{l}"] = jnp.zeros((1, 3 * HIDDEN), jnp.float32)
        pieces[f"wo{l}"]   = w((HIDDEN, HIDDEN))
        pieces[f"bo{l}"]   = jnp.zeros((1, HIDDEN), jnp.float32)
        pieces[f"ln1g{l}"] = jnp.ones((1, HIDDEN), jnp.float32)
        pieces[f"ln1b{l}"] = jnp.zeros((1, HIDDEN), jnp.float32)
        pieces[f"wi{l}"]   = w((HIDDEN, INTER))
        pieces[f"bi{l}"]   = jnp.zeros((1, INTER), jnp.float32)
        pieces[f"wo2{l}"]  = w((INTER, HIDDEN))
        pieces[f"bo2{l}"]  = jnp.zeros((1, HIDDEN), jnp.float32)
        pieces[f"ln2g{l}"] = jnp.ones((1, HIDDEN), jnp.float32)
        pieces[f"ln2b{l}"] = jnp.zeros((1, HIDDEN), jnp.float32)

    slab = jnp.zeros((SLAB_ROWS, LANE), jnp.float32)
    for name, arr in pieces.items():
        r0, nr, nc = LAYOUT[name]
        slab = slab.at[r0:r0 + nr, :nc].set(arr)

    return {
        "word_emb": w((VOCAB, HIDDEN)),
        "pos_emb":  w((MAX_POS, HIDDEN)),
        "type_emb": w((1, HIDDEN)),
        "slab": slab,
    }


# ---------------------------------------------------------------------------
# Full forward pass (mirrors RobertaForSequenceClassification.forward)
# ---------------------------------------------------------------------------
def model_forward(params, input_ids, attention_mask, labels):
    # RoBERTa position ids (create_position_ids_from_input_ids) -- JAX glue.
    not_pad = (input_ids != PAD_ID).astype(jnp.int32)
    position_ids = jnp.cumsum(not_pad, axis=1) * not_pad + PAD_ID

    # Embedding gathers are JAX glue (data-dependent HBM gather).
    emb = (params["word_emb"][input_ids]
           + params["pos_emb"][position_ids]
           + params["type_emb"][0])
    B, S, H = emb.shape
    emb2d = emb.reshape(B * S, H)

    # Additive attention bias: 0 for real tokens, -1e9 for padding.
    bias = (1.0 - attention_mask.astype(jnp.float32)) * -1e9          # (B, S)

    # TODO(synk): dropout layers are treated as eval-mode no-ops.
    hs, combined = fused_forward(emb2d, bias, labels.astype(jnp.int32), params["slab"])

    hs4 = hs.reshape(LAYERS + 1, B, S, H)
    hidden_states = tuple(hs4[i] for i in range(LAYERS + 1))
    logits = combined[:B, :NUM_LABELS]
    loss = combined[B, 0]

    # Matches SequenceClassifierOutput(loss, logits, hidden_states).
    return {"loss": loss, "logits": logits, "hidden_states": hidden_states}


if __name__ == "__main__":
    key = jax.random.PRNGKey(0)
    pkey, ikey, lkey = jax.random.split(key, 3)

    B, S = 2, 8
    params = init_params(pkey)

    input_ids = jax.random.randint(ikey, (B, S), 2, VOCAB, dtype=jnp.int32)
    attention_mask = jnp.array(
        [[1, 1, 1, 1, 1, 1, 1, 1],
         [1, 1, 1, 1, 1, 1, 0, 0]], dtype=jnp.int32)
    input_ids = jnp.where(attention_mask == 1, input_ids, PAD_ID)
    labels = jax.random.randint(lkey, (B,), 0, NUM_LABELS, dtype=jnp.int32)

    out = jax.jit(model_forward)(params, input_ids, attention_mask, labels)
    jax.block_until_ready(out)

    assert out["logits"].shape == (B, NUM_LABELS)
    assert out["loss"].shape == ()
    assert len(out["hidden_states"]) == LAYERS + 1
    assert all(h.shape == (B, S, HIDDEN) for h in out["hidden_states"])
    assert bool(jnp.isfinite(out["loss"]))
    print("KERNEL_OK")
</pallas_src>

<mosaic_0001>
module attributes {stable_mosaic.version = 11 : i64} {
  func.func @_fused_forward_kernel(%arg0: memref<16x32xf32, #tpu.memory_space<vmem>>, %arg1: memref<2x8xf32, #tpu.memory_space<vmem>>, %arg2: memref<2xi32, #tpu.memory_space<smem>>, %arg3: memref<544x128xf32, #tpu.memory_space<vmem>>, %arg4: memref<3x16x32xf32, #tpu.memory_space<vmem>>, %arg5: memref<8x128xf32, #tpu.memory_space<vmem>>) attributes {dimension_semantics = [], scalar_prefetch = 0 : i64, scratch_operands = 0 : i64, tpu.core_type = #tpu.core_type<tc>} {
    %c0 = arith.constant 0 : index
    %c0_0 = arith.constant 0 : index
    %0 = vector.load %arg0[%c0, %c0_0] : memref<16x32xf32, #tpu.memory_space<vmem>>, vector<16x32xf32>
    %c0_1 = arith.constant 0 : index
    %c0_2 = arith.constant 0 : index
    %1 = vector.load %arg3[%c0_1, %c0_2] : memref<544x128xf32, #tpu.memory_space<vmem>>, vector<1x32xf32>
    %c8 = arith.constant 8 : index
    %c0_3 = arith.constant 0 : index
    %2 = vector.load %arg3[%c8, %c0_3] : memref<544x128xf32, #tpu.memory_space<vmem>>, vector<1x32xf32>
    %cst = arith.constant dense<0.000000e+00> : vector<16xf32>
    %3 = vector.multi_reduction <add>, %0, %cst [1] : vector<16x32xf32> to vector<16xf32>
    %4 = vector.shape_cast %3 : vector<16xf32> to vector<16x1xf32>
    %cst_4 = arith.constant 3.200000e+01 : f32
    %5 = vector.broadcast %cst_4 : f32 to vector<16x1xf32>
    %6 = arith.divf %4, %5 : vector<16x1xf32>
    %7 = vector.broadcast %6 : vector<16x1xf32> to vector<16x32xf32>
    %8 = arith.subf %0, %7 : vector<16x32xf32>
    %9 = arith.mulf %8, %8 : vector<16x32xf32>
    %cst_5 = arith.constant dense<0.000000e+00> : vector<16xf32>
    %10 = vector.multi_reduction <add>, %9, %cst_5 [1] : vector<16x32xf32> to vector<16xf32>
    %11 = vector.shape_cast %10 : vector<16xf32> to vector<16x1xf32>
    %cst_6 = arith.constant 3.200000e+01 : f32
    %12 = vector.broadcast %cst_6 : f32 to vector<16x1xf32>
    %13 = arith.divf %11, %12 : vector<16x1xf32>
    %14 = vector.broadcast %6 : vector<16x1xf32> to vector<16x32xf32>
    %15 = arith.subf %0, %14 : vector<16x32xf32>
    %cst_7 = arith.constant 9.99999974E-6 : f32
    %16 = vector.broadcast %cst_7 : f32 to vector<16x1xf32>
    %17 = arith.addf %13, %16 : vector<16x1xf32>
    %18 = math.rsqrt %17 : vector<16x1xf32>
    %19 = vector.broadcast %18 : vector<16x1xf32> to vector<16x32xf32>
    %20 = arith.mulf %15, %19 : vector<16x32xf32>
    %21 = vector.broadcast %1 : vector<1x32xf32> to vector<16x32xf32>
    %22 = arith.mulf %20, %21 : vector<16x32xf32>
    %23 = vector.broadcast %2 : vector<1x32xf32> to vector<16x32xf32>
    %24 = arith.addf %22, %23 : vector<16x32xf32>
    %c0_8 = arith.constant 0 : index
    %c0_9 = arith.constant 0 : index
    %c0_10 = arith.constant 0 : index
    %25 = vector.load %arg4[%c0_8, %c0_9, %c0_10] : memref<3x16x32xf32, #tpu.memory_space<vmem>>, vector<1x16x32xf32>
    %26 = vector.shape_cast %25 : vector<1x16x32xf32> to vector<16x32xf32>
    %27 = vector.shape_cast %24 : vector<16x32xf32> to vector<1x16x32xf32>
    tpu.vector_store %arg4[%c0_8, %c0_9, %c0_10], %27 {strides = array<i32>} : memref<3x16x32xf32, #tpu.memory_space<vmem>>, vector<1x16x32xf32>,
    %c0_11 = arith.constant 0 : index
    %c0_12 = arith.constant 0 : index
    %28 = vector.load %arg1[%c0_11, %c0_12] : memref<2x8xf32, #tpu.memory_space<vmem>>, vector<2x8xf32>
    %29 = vector.shape_cast %28 : vector<2x8xf32> to vector<2x1x8xf32>
    %30 = vector.shape_cast %29 : vector<2x1x8xf32> to vector<2x1x8xf32>
    %31 = vector.broadcast %30 : vector<2x1x8xf32> to vector<2x8x8xf32>
    %c16 = arith.constant 16 : index
    %c0_13 = arith.constant 0 : index
    %32 = vector.load %arg3[%c16, %c0_13] : memref<544x128xf32, #tpu.memory_space<vmem>>, vector<32x96xf32>
    %cst_14 = arith.constant dense<0.000000e+00> : vector<16x96xf32>
    %33 = tpu.matmul %24, %32, %cst_14 {dimension_numbers = #tpu.dot_dimension_numbers<[1], [0], [0], [1], [0, 0, 1, 1], [], []>} : vector<16x32xf32>, vector<32x96xf32>, vector<16x96xf32> -> vector<16x96xf32>
    %c48 = arith.constant 48 : index
    %c0_15 = arith.constant 0 : index
    %34 = vector.load %arg3[%c48, %c0_15] : memref<544x128xf32, #tpu.memory_space<vmem>>, vector<1x96xf32>
    %35 = vector.broadcast %34 : vector<1x96xf32> to vector<16x96xf32>
    %36 = arith.addf %33, %35 : vector<16x96xf32>
    %37 = vector.shape_cast %36 : vector<16x96xf32> to vector<2x8x96xf32>
    %c56 = arith.constant 56 : index
    %c0_16 = arith.constant 0 : index
    %38 = vector.load %arg3[%c56, %c0_16] : memref<544x128xf32, #tpu.memory_space<vmem>>, vector<32x32xf32>
    %cst_17 = arith.constant 0.000000e+00 : f32
    %39 = vector.broadcast %cst_17 : f32 to vector<16x32xf32>
    %40 = vector.extract_strided_slice %37 {offsets = [0, 0, 0], sizes = [2, 8, 16], strides = [1, 1, 1]} : vector<2x8x96xf32> to vector<2x8x16xf32>
    %41 = vector.extract_strided_slice %37 {offsets = [0, 0, 32], sizes = [2, 8, 16], strides = [1, 1, 1]} : vector<2x8x96xf32> to vector<2x8x16xf32>
    %42 = vector.extract_strided_slice %37 {offsets = [0, 0, 64], sizes = [2, 8, 16], strides = [1, 1, 1]} : vector<2x8x96xf32> to vector<2x8x16xf32>
    "tpu.trace_start"() <{level = 10 : i32, message = "bqd,bkd->bqk"}> : () -> ()
    %cst_18 = arith.constant dense<0.000000e+00> : vector<2x8x8xf32>
    %43 = tpu.matmul %40, %41, %cst_18 {dimension_numbers = #tpu.dot_dimension_numbers<[2], [2], [1], [1], [0, 0, 0, 1, 1, 1], [0], [0]>} : vector<2x8x16xf32>, vector<2x8x16xf32>, vector<2x8x8xf32> -> vector<2x8x8xf32>
    "tpu.trace_stop"() : () -> ()
    %cst_19 = arith.constant 2.500000e-01 : f32
    %44 = vector.broadcast %cst_19 : f32 to vector<2x8x8xf32>
    %45 = arith.mulf %43, %44 : vector<2x8x8xf32>
    %46 = arith.addf %45, %31 : vector<2x8x8xf32>
    %cst_20 = arith.constant dense<0xFF800000> : vector<2x8xf32>
    %47 = vector.multi_reduction <maximumf>, %46, %cst_20 [2] : vector<2x8x8xf32> to vector<2x8xf32>
    %cst_21 = arith.constant 0xFF800000 : f32
    %48 = vector.broadcast %cst_21 : f32 to vector<2x8xf32>
    %49 = arith.maximumf %48, %47 : vector<2x8xf32>
    %50 = vector.shape_cast %49 : vector<2x8xf32> to vector<2x8x1xf32>
    %51 = vector.broadcast %50 : vector<2x8x1xf32> to vector<2x8x8xf32>
    %52 = arith.subf %46, %51 : vector<2x8x8xf32>
    %53 = math.exp %52 : vector<2x8x8xf32>
    %cst_22 = arith.constant dense<0.000000e+00> : vector<2x8xf32>
    %54 = vector.multi_reduction <add>, %53, %cst_22 [2] : vector<2x8x8xf32> to vector<2x8xf32>
    %55 = vector.shape_cast %54 : vector<2x8xf32> to vector<2x8x1xf32>
    %56 = vector.broadcast %55 : vector<2x8x1xf32> to vector<2x8x8xf32>
    %57 = arith.divf %53, %56 : vector<2x8x8xf32>
    "tpu.trace_start"() <{level = 10 : i32, message = "bqk,bkd->bqd"}> : () -> ()
    %cst_23 = arith.constant dense<0.000000e+00> : vector<2x8x16xf32>
    %58 = tpu.matmul %57, %42, %cst_23 {dimension_numbers = #tpu.dot_dimension_numbers<[2], [1], [1], [2], [0, 0, 0, 1, 1, 2], [0], [0]>} : vector<2x8x8xf32>, vector<2x8x16xf32>, vector<2x8x16xf32> -> vector<2x8x16xf32>
    "tpu.trace_stop"() : () -> ()
    %59 = vector.shape_cast %58 : vector<2x8x16xf32> to vector<16x16xf32>
    %60 = vector.extract_strided_slice %38 {offsets = [0, 0], sizes = [16, 32], strides = [1, 1]} : vector<32x32xf32> to vector<16x32xf32>
    %cst_24 = arith.constant dense<0.000000e+00> : vector<16x32xf32>
    %61 = tpu.matmul %59, %60, %cst_24 {dimension_numbers = #tpu.dot_dimension_numbers<[1], [0], [0], [1], [0, 0, 1, 1], [], []>} : vector<16x16xf32>, vector<16x32xf32>, vector<16x32xf32> -> vector<16x32xf32>
    %62 = arith.addf %39, %61 : vector<16x32xf32>
    %63 = vector.extract_strided_slice %37 {offsets = [0, 0, 16], sizes = [2, 8, 16], strides = [1, 1, 1]} : vector<2x8x96xf32> to vector<2x8x16xf32>
    %64 = vector.extract_strided_slice %37 {offsets = [0, 0, 48], sizes = [2, 8, 16], strides = [1, 1, 1]} : vector<2x8x96xf32> to vector<2x8x16xf32>
    %65 = vector.extract_strided_slice %37 {offsets = [0, 0, 80], sizes = [2, 8, 16], strides = [1, 1, 1]} : vector<2x8x96xf32> to vector<2x8x16xf32>
    "tpu.trace_start"() <{level = 10 : i32, message = "bqd,bkd->bqk"}> : () -> ()
    %cst_25 = arith.constant dense<0.000000e+00> : vector<2x8x8xf32>
    %66 = tpu.matmul %63, %64, %cst_25 {dimension_numbers = #tpu.dot_dimension_numbers<[2], [2], [1], [1], [0, 0, 0, 1, 1, 1], [0], [0]>} : vector<2x8x16xf32>, vector<2x8x16xf32>, vector<2x8x8xf32> -> vector<2x8x8xf32>
    "tpu.trace_stop"() : () -> ()
    %cst_26 = arith.constant 2.500000e-01 : f32
    %67 = vector.broadcast %cst_26 : f32 to vector<2x8x8xf32>
    %68 = arith.mulf %66, %67 : vector<2x8x8xf32>
    %69 = arith.addf %68, %31 : vector<2x8x8xf32>
    %cst_27 = arith.constant dense<0xFF800000> : vector<2x8xf32>
    %70 = vector.multi_reduction <maximumf>, %69, %cst_27 [2] : vector<2x8x8xf32> to vector<2x8xf32>
    %cst_28 = arith.constant 0xFF800000 : f32
    %71 = vector.broadcast %cst_28 : f32 to vector<2x8xf32>
    %72 = arith.maximumf %71, %70 : vector<2x8xf32>
    %73 = vector.shape_cast %72 : vector<2x8xf32> to vector<2x8x1xf32>
    %74 = vector.broadcast %73 : vector<2x8x1xf32> to vector<2x8x8xf32>
    %75 = arith.subf %69, %74 : vector<2x8x8xf32>
    %76 = math.exp %75 : vector<2x8x8xf32>
    %cst_29 = arith.constant dense<0.000000e+00> : vector<2x8xf32>
    %77 = vector.multi_reduction <add>, %76, %cst_29 [2] : vector<2x8x8xf32> to vector<2x8xf32>
    %78 = vector.shape_cast %77 : vector<2x8xf32> to vector<2x8x1xf32>
    %79 = vector.broadcast %78 : vector<2x8x1xf32> to vector<2x8x8xf32>
    %80 = arith.divf %76, %79 : vector<2x8x8xf32>
    "tpu.trace_start"() <{level = 10 : i32, message = "bqk,bkd->bqd"}> : () -> ()
    %cst_30 = arith.constant dense<0.000000e+00> : vector<2x8x16xf32>
    %81 = tpu.matmul %80, %65, %cst_30 {dimension_numbers = #tpu.dot_dimension_numbers<[2], [1], [1], [2], [0, 0, 0, 1, 1, 2], [0], [0]>} : vector<2x8x8xf32>, vector<2x8x16xf32>, vector<2x8x16xf32> -> vector<2x8x16xf32>
    "tpu.trace_stop"() : () -> ()
    %82 = vector.shape_cast %81 : vector<2x8x16xf32> to vector<16x16xf32>
    %83 = vector.extract_strided_slice %38 {offsets = [16, 0], sizes = [16, 32], strides = [1, 1]} : vector<32x32xf32> to vector<16x32xf32>
    %cst_31 = arith.constant dense<0.000000e+00> : vector<16x32xf32>
    %84 = tpu.matmul %82, %83, %cst_31 {dimension_numbers = #tpu.dot_dimension_numbers<[1], [0], [0], [1], [0, 0, 1, 1], [], []>} : vector<16x16xf32>, vector<16x32xf32>, vector<16x32xf32> -> vector<16x32xf32>
    %85 = arith.addf %62, %84 : vector<16x32xf32>
    %c88 = arith.constant 88 : index
    %c0_32 = arith.constant 0 : index
    %86 = vector.load %arg3[%c88, %c0_32] : memref<544x128xf32, #tpu.memory_space<vmem>>, vector<1x32xf32>
    %87 = vector.broadcast %86 : vector<1x32xf32> to vector<16x32xf32>
    %88 = arith.addf %85, %87 : vector<16x32xf32>
    %89 = arith.addf %24, %88 : vector<16x32xf32>
    %c96 = arith.constant 96 : index
    %c0_33 = arith.constant 0 : index
    %90 = vector.load %arg3[%c96, %c0_33] : memref<544x128xf32, #tpu.memory_space<vmem>>, vector<1x32xf32>
    %c104 = arith.constant 104 : index
    %c0_34 = arith.constant 0 : index
    %91 = vector.load %arg3[%c104, %c0_34] : memref<544x128xf32, #tpu.memory_space<vmem>>, vector<1x32xf32>
    %cst_35 = arith.constant dense<0.000000e+00> : vector<16xf32>
    %92 = vector.multi_reduction <add>, %89, %cst_35 [1] : vector<16x32xf32> to vector<16xf32>
    %93 = vector.shape_cast %92 : vector<16xf32> to vector<16x1xf32>
    %cst_36 = arith.constant 3.200000e+01 : f32
    %94 = vector.broadcast %cst_36 : f32 to vector<16x1xf32>
    %95 = arith.divf %93, %94 : vector<16x1xf32>
    %96 = vector.broadcast %95 : vector<16x1xf32> to vector<16x32xf32>
    %97 = arith.subf %89, %96 : vector<16x32xf32>
    %98 = arith.mulf %97, %97 : vector<16x32xf32>
    %cst_37 = arith.constant dense<0.000000e+00> : vector<16xf32>
    %99 = vector.multi_reduction <add>, %98, %cst_37 [1] : vector<16x32xf32> to vector<16xf32>
    %100 = vector.shape_cast %99 : vector<16xf32> to vector<16x1xf32>
    %cst_38 = arith.constant 3.200000e+01 : f32
    %101 = vector.broadcast %cst_38 : f32 to vector<16x1xf32>
    %102 = arith.divf %100, %101 : vector<16x1xf32>
    %103 = vector.broadcast %95 : vector<16x1xf32> to vector<16x32xf32>
    %104 = arith.subf %89, %103 : vector<16x32xf32>
    %cst_39 = arith.constant 9.99999974E-6 : f32
    %105 = vector.broadcast %cst_39 : f32 to vector<16x1xf32>
    %106 = arith.addf %102, %105 : vector<16x1xf32>
    %107 = math.rsqrt %106 : vector<16x1xf32>
    %108 = vector.broadcast %107 : vector<16x1xf32> to vector<16x32xf32>
    %109 = arith.mulf %104, %108 : vector<16x32xf32>
    %110 = vector.broadcast %90 : vector<1x32xf32> to vector<16x32xf32>
    %111 = arith.mulf %109, %110 : vector<16x32xf32>
    %112 = vector.broadcast %91 : vector<1x32xf32> to vector<16x32xf32>
    %113 = arith.addf %111, %112 : vector<16x32xf32>
    %c112 = arith.constant 112 : index
    %c0_40 = arith.constant 0 : index
    %114 = vector.load %arg3[%c112, %c0_40] : memref<544x128xf32, #tpu.memory_space<vmem>>, vector<32x64xf32>
    %cst_41 = arith.constant dense<0.000000e+00> : vector<16x64xf32>
    %115 = tpu.matmul %113, %114, %cst_41 {dimension_numbers = #tpu.dot_dimension_numbers<[1], [0], [0], [1], [0, 0, 1, 1], [], []>} : vector<16x32xf32>, vector<32x64xf32>, vector<16x64xf32> -> vector<16x64xf32>
    %c144 = arith.constant 144 : index
    %c0_42 = arith.constant 0 : index
    %116 = vector.load %arg3[%c144, %c0_42] : memref<544x128xf32, #tpu.memory_space<vmem>>, vector<1x64xf32>
    %117 = vector.broadcast %116 : vector<1x64xf32> to vector<16x64xf32>
    %118 = arith.addf %115, %117 : vector<16x64xf32>
    %cst_43 = arith.constant 5.000000e-01 : f32
    %119 = vector.broadcast %cst_43 : f32 to vector<16x64xf32>
    %120 = arith.mulf %119, %118 : vector<16x64xf32>
    %cst_44 = arith.constant 0.707106769 : f32
    %121 = vector.broadcast %cst_44 : f32 to vector<16x64xf32>
    %122 = arith.mulf %118, %121 : vector<16x64xf32>
    %123 = math.erf %122 : vector<16x64xf32>
    %cst_45 = arith.constant 1.000000e+00 : f32
    %124 = vector.broadcast %cst_45 : f32 to vector<16x64xf32>
    %125 = arith.addf %124, %123 : vector<16x64xf32>
    %126 = arith.mulf %120, %125 : vector<16x64xf32>
    %c152 = arith.constant 152 : index
    %c0_46 = arith.constant 0 : index
    %127 = vector.load %arg3[%c152, %c0_46] : memref<544x128xf32, #tpu.memory_space<vmem>>, vector<64x32xf32>
    %cst_47 = arith.constant dense<0.000000e+00> : vector<16x32xf32>
    %128 = tpu.matmul %126, %127, %cst_47 {dimension_numbers = #tpu.dot_dimension_numbers<[1], [0], [0], [1], [0, 0, 1, 1], [], []>} : vector<16x64xf32>, vector<64x32xf32>, vector<16x32xf32> -> vector<16x32xf32>
    %c216 = arith.constant 216 : index
    %c0_48 = arith.constant 0 : index
    %129 = vector.load %arg3[%c216, %c0_48] : memref<544x128xf32, #tpu.memory_space<vmem>>, vector<1x32xf32>
    %130 = vector.broadcast %129 : vector<1x32xf32> to vector<16x32xf32>
    %131 = arith.addf %128, %130 : vector<16x32xf32>
    %132 = arith.addf %113, %131 : vector<16x32xf32>
    %c224 = arith.constant 224 : index
    %c0_49 = arith.constant 0 : index
    %133 = vector.load %arg3[%c224, %c0_49] : memref<544x128xf32, #tpu.memory_space<vmem>>, vector<1x32xf32>
    %c232 = arith.constant 232 : index
    %c0_50 = arith.constant 0 : index
    %134 = vector.load %arg3[%c232, %c0_50] : memref<544x128xf32, #tpu.memory_space<vmem>>, vector<1x32xf32>
    %cst_51 = arith.constant dense<0.000000e+00> : vector<16xf32>
    %135 = vector.multi_reduction <add>, %132, %cst_51 [1] : vector<16x32xf32> to vector<16xf32>
    %136 = vector.shape_cast %135 : vector<16xf32> to vector<16x1xf32>
    %cst_52 = arith.constant 3.200000e+01 : f32
    %137 = vector.broadcast %cst_52 : f32 to vector<16x1xf32>
    %138 = arith.divf %136, %137 : vector<16x1xf32>
    %139 = vector.broadcast %138 : vector<16x1xf32> to vector<16x32xf32>
    %140 = arith.subf %132, %139 : vector<16x32xf32>
    %141 = arith.mulf %140, %140 : vector<16x32xf32>
    %cst_53 = arith.constant dense<0.000000e+00> : vector<16xf32>
    %142 = vector.multi_reduction <add>, %141, %cst_53 [1] : vector<16x32xf32> to vector<16xf32>
    %143 = vector.shape_cast %142 : vector<16xf32> to vector<16x1xf32>
    %cst_54 = arith.constant 3.200000e+01 : f32
    %144 = vector.broadcast %cst_54 : f32 to vector<16x1xf32>
    %145 = arith.divf %143, %144 : vector<16x1xf32>
    %146 = vector.broadcast %138 : vector<16x1xf32> to vector<16x32xf32>
    %147 = arith.subf %132, %146 : vector<16x32xf32>
    %cst_55 = arith.constant 9.99999974E-6 : f32
    %148 = vector.broadcast %cst_55 : f32 to vector<16x1xf32>
    %149 = arith.addf %145, %148 : vector<16x1xf32>
    %150 = math.rsqrt %149 : vector<16x1xf32>
    %151 = vector.broadcast %150 : vector<16x1xf32> to vector<16x32xf32>
    %152 = arith.mulf %147, %151 : vector<16x32xf32>
    %153 = vector.broadcast %133 : vector<1x32xf32> to vector<16x32xf32>
    %154 = arith.mulf %152, %153 : vector<16x32xf32>
    %155 = vector.broadcast %134 : vector<1x32xf32> to vector<16x32xf32>
    %156 = arith.addf %154, %155 : vector<16x32xf32>
    %c1 = arith.constant 1 : index
    %c0_56 = arith.constant 0 : index
    %c0_57 = arith.constant 0 : index
    %157 = vector.load %arg4[%c1, %c0_56, %c0_57] : memref<3x16x32xf32, #tpu.memory_space<vmem>>, vector<1x16x32xf32>
    %158 = vector.shape_cast %157 : vector<1x16x32xf32> to vector<16x32xf32>
    %159 = vector.shape_cast %156 : vector<16x32xf32> to vector<1x16x32xf32>
    tpu.vector_store %arg4[%c1, %c0_56, %c0_57], %159 {strides = array<i32>} : memref<3x16x32xf32, #tpu.memory_space<vmem>>, vector<1x16x32xf32>,
    %c240 = arith.constant 240 : index
    %c0_58 = arith.constant 0 : index
    %160 = vector.load %arg3[%c240, %c0_58] : memref<544x128xf32, #tpu.memory_space<vmem>>, vector<32x96xf32>
    %cst_59 = arith.constant dense<0.000000e+00> : vector<16x96xf32>
    %161 = tpu.matmul %156, %160, %cst_59 {dimension_numbers = #tpu.dot_dimension_numbers<[1], [0], [0], [1], [0, 0, 1, 1], [], []>} : vector<16x32xf32>, vector<32x96xf32>, vector<16x96xf32> -> vector<16x96xf32>
    %c272 = arith.constant 272 : index
    %c0_60 = arith.constant 0 : index
    %162 = vector.load %arg3[%c272, %c0_60] : memref<544x128xf32, #tpu.memory_space<vmem>>, vector<1x96xf32>
    %163 = vector.broadcast %162 : vector<1x96xf32> to vector<16x96xf32>
    %164 = arith.addf %161, %163 : vector<16x96xf32>
    %165 = vector.shape_cast %164 : vector<16x96xf32> to vector<2x8x96xf32>
    %c280 = arith.constant 280 : index
    %c0_61 = arith.constant 0 : index
    %166 = vector.load %arg3[%c280, %c0_61] : memref<544x128xf32, #tpu.memory_space<vmem>>, vector<32x32xf32>
    %cst_62 = arith.constant 0.000000e+00 : f32
    %167 = vector.broadcast %cst_62 : f32 to vector<16x32xf32>
    %168 = vector.extract_strided_slice %165 {offsets = [0, 0, 0], sizes = [2, 8, 16], strides = [1, 1, 1]} : vector<2x8x96xf32> to vector<2x8x16xf32>
    %169 = vector.extract_strided_slice %165 {offsets = [0, 0, 32], sizes = [2, 8, 16], strides = [1, 1, 1]} : vector<2x8x96xf32> to vector<2x8x16xf32>
    %170 = vector.extract_strided_slice %165 {offsets = [0, 0, 64], sizes = [2, 8, 16], strides = [1, 1, 1]} : vector<2x8x96xf32> to vector<2x8x16xf32>
    "tpu.trace_start"() <{level = 10 : i32, message = "bqd,bkd->bqk"}> : () -> ()
    %cst_63 = arith.constant dense<0.000000e+00> : vector<2x8x8xf32>
    %171 = tpu.matmul %168, %169, %cst_63 {dimension_numbers = #tpu.dot_dimension_numbers<[2], [2], [1], [1], [0, 0, 0, 1, 1, 1], [0], [0]>} : vector<2x8x16xf32>, vector<2x8x16xf32>, vector<2x8x8xf32> -> vector<2x8x8xf32>
    "tpu.trace_stop"() : () -> ()
    %cst_64 = arith.constant 2.500000e-01 : f32
    %172 = vector.broadcast %cst_64 : f32 to vector<2x8x8xf32>
    %173 = arith.mulf %171, %172 : vector<2x8x8xf32>
    %174 = arith.addf %173, %31 : vector<2x8x8xf32>
    %cst_65 = arith.constant dense<0xFF800000> : vector<2x8xf32>
    %175 = vector.multi_reduction <maximumf>, %174, %cst_65 [2] : vector<2x8x8xf32> to vector<2x8xf32>
    %cst_66 = arith.constant 0xFF800000 : f32
    %176 = vector.broadcast %cst_66 : f32 to vector<2x8xf32>
    %177 = arith.maximumf %176, %175 : vector<2x8xf32>
    %178 = vector.shape_cast %177 : vector<2x8xf32> to vector<2x8x1xf32>
    %179 = vector.broadcast %178 : vector<2x8x1xf32> to vector<2x8x8xf32>
    %180 = arith.subf %174, %179 : vector<2x8x8xf32>
    %181 = math.exp %180 : vector<2x8x8xf32>
    %cst_67 = arith.constant dense<0.000000e+00> : vector<2x8xf32>
    %182 = vector.multi_reduction <add>, %181, %cst_67 [2] : vector<2x8x8xf32> to vector<2x8xf32>
    %183 = vector.shape_cast %182 : vector<2x8xf32> to vector<2x8x1xf32>
    %184 = vector.broadcast %183 : vector<2x8x1xf32> to vector<2x8x8xf32>
    %185 = arith.divf %181, %184 : vector<2x8x8xf32>
    "tpu.trace_start"() <{level = 10 : i32, message = "bqk,bkd->bqd"}> : () -> ()
    %cst_68 = arith.constant dense<0.000000e+00> : vector<2x8x16xf32>
    %186 = tpu.matmul %185, %170, %cst_68 {dimension_numbers = #tpu.dot_dimension_numbers<[2], [1], [1], [2], [0, 0, 0, 1, 1, 2], [0], [0]>} : vector<2x8x8xf32>, vector<2x8x16xf32>, vector<2x8x16xf32> -> vector<2x8x16xf32>
    "tpu.trace_stop"() : () -> ()
    %187 = vector.shape_cast %186 : vector<2x8x16xf32> to vector<16x16xf32>
    %188 = vector.extract_strided_slice %166 {offsets = [0, 0], sizes = [16, 32], strides = [1, 1]} : vector<32x32xf32> to vector<16x32xf32>
    %cst_69 = arith.constant dense<0.000000e+00> : vector<16x32xf32>
    %189 = tpu.matmul %187, %188, %cst_69 {dimension_numbers = #tpu.dot_dimension_numbers<[1], [0], [0], [1], [0, 0, 1, 1], [], []>} : vector<16x16xf32>, vector<16x32xf32>, vector<16x32xf32> -> vector<16x32xf32>
    %190 = arith.addf %167, %189 : vector<16x32xf32>
    %191 = vector.extract_strided_slice %165 {offsets = [0, 0, 16], sizes = [2, 8, 16], strides = [1, 1, 1]} : vector<2x8x96xf32> to vector<2x8x16xf32>
    %192 = vector.extract_strided_slice %165 {offsets = [0, 0, 48], sizes = [2, 8, 16], strides = [1, 1, 1]} : vector<2x8x96xf32> to vector<2x8x16xf32>
    %193 = vector.extract_strided_slice %165 {offsets = [0, 0, 80], sizes = [2, 8, 16], strides = [1, 1, 1]} : vector<2x8x96xf32> to vector<2x8x16xf32>
    "tpu.trace_start"() <{level = 10 : i32, message = "bqd,bkd->bqk"}> : () -> ()
    %cst_70 = arith.constant dense<0.000000e+00> : vector<2x8x8xf32>
    %194 = tpu.matmul %191, %192, %cst_70 {dimension_numbers = #tpu.dot_dimension_numbers<[2], [2], [1], [1], [0, 0, 0, 1, 1, 1], [0], [0]>} : vector<2x8x16xf32>, vector<2x8x16xf32>, vector<2x8x8xf32> -> vector<2x8x8xf32>
    "tpu.trace_stop"() : () -> ()
    %cst_71 = arith.constant 2.500000e-01 : f32
    %195 = vector.broadcast %cst_71 : f32 to vector<2x8x8xf32>
    %196 = arith.mulf %194, %195 : vector<2x8x8xf32>
    %197 = arith.addf %196, %31 : vector<2x8x8xf32>
    %cst_72 = arith.constant dense<0xFF800000> : vector<2x8xf32>
    %198 = vector.multi_reduction <maximumf>, %197, %cst_72 [2] : vector<2x8x8xf32> to vector<2x8xf32>
    %cst_73 = arith.constant 0xFF800000 : f32
    %199 = vector.broadcast %cst_73 : f32 to vector<2x8xf32>
    %200 = arith.maximumf %199, %198 : vector<2x8xf32>
    %201 = vector.shape_cast %200 : vector<2x8xf32> to vector<2x8x1xf32>
    %202 = vector.broadcast %201 : vector<2x8x1xf32> to vector<2x8x8xf32>
    %203 = arith.subf %197, %202 : vector<2x8x8xf32>
    %204 = math.exp %203 : vector<2x8x8xf32>
    %cst_74 = arith.constant dense<0.000000e+00> : vector<2x8xf32>
    %205 = vector.multi_reduction <add>, %204, %cst_74 [2] : vector<2x8x8xf32> to vector<2x8xf32>
    %206 = vector.shape_cast %205 : vector<2x8xf32> to vector<2x8x1xf32>
    %207 = vector.broadcast %206 : vector<2x8x1xf32> to vector<2x8x8xf32>
    %208 = arith.divf %204, %207 : vector<2x8x8xf32>
    "tpu.trace_start"() <{level = 10 : i32, message = "bqk,bkd->bqd"}> : () -> ()
    %cst_75 = arith.constant dense<0.000000e+00> : vector<2x8x16xf32>
    %209 = tpu.matmul %208, %193, %cst_75 {dimension_numbers = #tpu.dot_dimension_numbers<[2], [1], [1], [2], [0, 0, 0, 1, 1, 2], [0], [0]>} : vector<2x8x8xf32>, vector<2x8x16xf32>, vector<2x8x16xf32> -> vector<2x8x16xf32>
    "tpu.trace_stop"() : () -> ()
    %210 = vector.shape_cast %209 : vector<2x8x16xf32> to vector<16x16xf32>
    %211 = vector.extract_strided_slice %166 {offsets = [16, 0], sizes = [16, 32], strides = [1, 1]} : vector<32x32xf32> to vector<16x32xf32>
    %cst_76 = arith.constant dense<0.000000e+00> : vector<16x32xf32>
    %212 = tpu.matmul %210, %211, %cst_76 {dimension_numbers = #tpu.dot_dimension_numbers<[1], [0], [0], [1], [0, 0, 1, 1], [], []>} : vector<16x16xf32>, vector<16x32xf32>, vector<16x32xf32> -> vector<16x32xf32>
    %213 = arith.addf %190, %212 : vector<16x32xf32>
    %c312 = arith.constant 312 : index
    %c0_77 = arith.constant 0 : index
    %214 = vector.load %arg3[%c312, %c0_77] : memref<544x128xf32, #tpu.memory_space<vmem>>, vector<1x32xf32>
    %215 = vector.broadcast %214 : vector<1x32xf32> to vector<16x32xf32>
    %216 = arith.addf %213, %215 : vector<16x32xf32>
    %217 = arith.addf %156, %216 : vector<16x32xf32>
    %c320 = arith.constant 320 : index
    %c0_78 = arith.constant 0 : index
    %218 = vector.load %arg3[%c320, %c0_78] : memref<544x128xf32, #tpu.memory_space<vmem>>, vector<1x32xf32>
    %c328 = arith.constant 328 : index
    %c0_79 = arith.constant 0 : index
    %219 = vector.load %arg3[%c328, %c0_79] : memref<544x128xf32, #tpu.memory_space<vmem>>, vector<1x32xf32>
    %cst_80 = arith.constant dense<0.000000e+00> : vector<16xf32>
    %220 = vector.multi_reduction <add>, %217, %cst_80 [1] : vector<16x32xf32> to vector<16xf32>
    %221 = vector.shape_cast %220 : vector<16xf32> to vector<16x1xf32>
    %cst_81 = arith.constant 3.200000e+01 : f32
    %222 = vector.broadcast %cst_81 : f32 to vector<16x1xf32>
    %223 = arith.divf %221, %222 : vector<16x1xf32>
    %224 = vector.broadcast %223 : vector<16x1xf32> to vector<16x32xf32>
    %225 = arith.subf %217, %224 : vector<16x32xf32>
    %226 = arith.mulf %225, %225 : vector<16x32xf32>
    %cst_82 = arith.constant dense<0.000000e+00> : vector<16xf32>
    %227 = vector.multi_reduction <add>, %226, %cst_82 [1] : vector<16x32xf32> to vector<16xf32>
    %228 = vector.shape_cast %227 : vector<16xf32> to vector<16x1xf32>
    %cst_83 = arith.constant 3.200000e+01 : f32
    %229 = vector.broadcast %cst_83 : f32 to vector<16x1xf32>
    %230 = arith.divf %228, %229 : vector<16x1xf32>
    %231 = vector.broadcast %223 : vector<16x1xf32> to vector<16x32xf32>
    %232 = arith.subf %217, %231 : vector<16x32xf32>
    %cst_84 = arith.constant 9.99999974E-6 : f32
    %233 = vector.broadcast %cst_84 : f32 to vector<16x1xf32>
    %234 = arith.addf %230, %233 : vector<16x1xf32>
    %235 = math.rsqrt %234 : vector<16x1xf32>
    %236 = vector.broadcast %235 : vector<16x1xf32> to vector<16x32xf32>
    %237 = arith.mulf %232, %236 : vector<16x32xf32>
    %238 = vector.broadcast %218 : vector<1x32xf32> to vector<16x32xf32>
    %239 = arith.mulf %237, %238 : vector<16x32xf32>
    %240 = vector.broadcast %219 : vector<1x32xf32> to vector<16x32xf32>
    %241 = arith.addf %239, %240 : vector<16x32xf32>
    %c336 = arith.constant 336 : index
    %c0_85 = arith.constant 0 : index
    %242 = vector.load %arg3[%c336, %c0_85] : memref<544x128xf32, #tpu.memory_space<vmem>>, vector<32x64xf32>
    %cst_86 = arith.constant dense<0.000000e+00> : vector<16x64xf32>
    %243 = tpu.matmul %241, %242, %cst_86 {dimension_numbers = #tpu.dot_dimension_numbers<[1], [0], [0], [1], [0, 0, 1, 1], [], []>} : vector<16x32xf32>, vector<32x64xf32>, vector<16x64xf32> -> vector<16x64xf32>
    %c368 = arith.constant 368 : index
    %c0_87 = arith.constant 0 : index
    %244 = vector.load %arg3[%c368, %c0_87] : memref<544x128xf32, #tpu.memory_space<vmem>>, vector<1x64xf32>
    %245 = vector.broadcast %244 : vector<1x64xf32> to vector<16x64xf32>
    %246 = arith.addf %243, %245 : vector<16x64xf32>
    %cst_88 = arith.constant 5.000000e-01 : f32
    %247 = vector.broadcast %cst_88 : f32 to vector<16x64xf32>
    %248 = arith.mulf %247, %246 : vector<16x64xf32>
    %cst_89 = arith.constant 0.707106769 : f32
    %249 = vector.broadcast %cst_89 : f32 to vector<16x64xf32>
    %250 = arith.mulf %246, %249 : vector<16x64xf32>
    %251 = math.erf %250 : vector<16x64xf32>
    %cst_90 = arith.constant 1.000000e+00 : f32
    %252 = vector.broadcast %cst_90 : f32 to vector<16x64xf32>
    %253 = arith.addf %252, %251 : vector<16x64xf32>
    %254 = arith.mulf %248, %253 : vector<16x64xf32>
    %c376 = arith.constant 376 : index
    %c0_91 = arith.constant 0 : index
    %255 = vector.load %arg3[%c376, %c0_91] : memref<544x128xf32, #tpu.memory_space<vmem>>, vector<64x32xf32>
    %cst_92 = arith.constant dense<0.000000e+00> : vector<16x32xf32>
    %256 = tpu.matmul %254, %255, %cst_92 {dimension_numbers = #tpu.dot_dimension_numbers<[1], [0], [0], [1], [0, 0, 1, 1], [], []>} : vector<16x64xf32>, vector<64x32xf32>, vector<16x32xf32> -> vector<16x32xf32>
    %c440 = arith.constant 440 : index
    %c0_93 = arith.constant 0 : index
    %257 = vector.load %arg3[%c440, %c0_93] : memref<544x128xf32, #tpu.memory_space<vmem>>, vector<1x32xf32>
    %258 = vector.broadcast %257 : vector<1x32xf32> to vector<16x32xf32>
    %259 = arith.addf %256, %258 : vector<16x32xf32>
    %260 = arith.addf %241, %259 : vector<16x32xf32>
    %c448 = arith.constant 448 : index
    %c0_94 = arith.constant 0 : index
    %261 = vector.load %arg3[%c448, %c0_94] : memref<544x128xf32, #tpu.memory_space<vmem>>, vector<1x32xf32>
    %c456 = arith.constant 456 : index
    %c0_95 = arith.constant 0 : index
    %262 = vector.load %arg3[%c456, %c0_95] : memref<544x128xf32, #tpu.memory_space<vmem>>, vector<1x32xf32>
    %cst_96 = arith.constant dense<0.000000e+00> : vector<16xf32>
    %263 = vector.multi_reduction <add>, %260, %cst_96 [1] : vector<16x32xf32> to vector<16xf32>
    %264 = vector.shape_cast %263 : vector<16xf32> to vector<16x1xf32>
    %cst_97 = arith.constant 3.200000e+01 : f32
    %265 = vector.broadcast %cst_97 : f32 to vector<16x1xf32>
    %266 = arith.divf %264, %265 : vector<16x1xf32>
    %267 = vector.broadcast %266 : vector<16x1xf32> to vector<16x32xf32>
    %268 = arith.subf %260, %267 : vector<16x32xf32>
    %269 = arith.mulf %268, %268 : vector<16x32xf32>
    %cst_98 = arith.constant dense<0.000000e+00> : vector<16xf32>
    %270 = vector.multi_reduction <add>, %269, %cst_98 [1] : vector<16x32xf32> to vector<16xf32>
    %271 = vector.shape_cast %270 : vector<16xf32> to vector<16x1xf32>
    %cst_99 = arith.constant 3.200000e+01 : f32
    %272 = vector.broadcast %cst_99 : f32 to vector<16x1xf32>
    %273 = arith.divf %271, %272 : vector<16x1xf32>
    %274 = vector.broadcast %266 : vector<16x1xf32> to vector<16x32xf32>
    %275 = arith.subf %260, %274 : vector<16x32xf32>
    %cst_100 = arith.constant 9.99999974E-6 : f32
    %276 = vector.broadcast %cst_100 : f32 to vector<16x1xf32>
    %277 = arith.addf %273, %276 : vector<16x1xf32>
    %278 = math.rsqrt %277 : vector<16x1xf32>
    %279 = vector.broadcast %278 : vector<16x1xf32> to vector<16x32xf32>
    %280 = arith.mulf %275, %279 : vector<16x32xf32>
    %281 = vector.broadcast %261 : vector<1x32xf32> to vector<16x32xf32>
    %282 = arith.mulf %280, %281 : vector<16x32xf32>
    %283 = vector.broadcast %262 : vector<1x32xf32> to vector<16x32xf32>
    %284 = arith.addf %282, %283 : vector<16x32xf32>
    %c2 = arith.constant 2 : index
    %c0_101 = arith.constant 0 : index
    %c0_102 = arith.constant 0 : index
    %285 = vector.load %arg4[%c2, %c0_101, %c0_102] : memref<3x16x32xf32, #tpu.memory_space<vmem>>, vector<1x16x32xf32>
    %286 = vector.shape_cast %285 : vector<1x16x32xf32> to vector<16x32xf32>
    %287 = vector.shape_cast %284 : vector<16x32xf32> to vector<1x16x32xf32>
    tpu.vector_store %arg4[%c2, %c0_101, %c0_102], %287 {strides = array<i32>} : memref<3x16x32xf32, #tpu.memory_space<vmem>>, vector<1x16x32xf32>,
    %288 = vector.extract_strided_slice %284 {offsets = [0, 0], sizes = [1, 32], strides = [1, 1]} : vector<16x32xf32> to vector<1x32xf32>
    %289 = vector.extract_strided_slice %284 {offsets = [8, 0], sizes = [1, 32], strides = [1, 1]} : vector<16x32xf32> to vector<1x32xf32>
    %290 = tpu.concatenate %288, %289 in 0 : vector<1x32xf32>, vector<1x32xf32> -> vector<2x32xf32>
    %c464 = arith.constant 464 : index
    %c0_103 = arith.constant 0 : index
    %291 = vector.load %arg3[%c464, %c0_103] : memref<544x128xf32, #tpu.memory_space<vmem>>, vector<32x32xf32>
    %cst_104 = arith.constant dense<0.000000e+00> : vector<2x32xf32>
    %292 = tpu.matmul %290, %291, %cst_104 {dimension_numbers = #tpu.dot_dimension_numbers<[1], [0], [0], [1], [0, 0, 1, 1], [], []>} : vector<2x32xf32>, vector<32x32xf32>, vector<2x32xf32> -> vector<2x32xf32>
    %c496 = arith.constant 496 : index
    %c0_105 = arith.constant 0 : index
    %293 = vector.load %arg3[%c496, %c0_105] : memref<544x128xf32, #tpu.memory_space<vmem>>, vector<1x32xf32>
    %294 = vector.broadcast %293 : vector<1x32xf32> to vector<2x32xf32>
    %295 = arith.addf %292, %294 : vector<2x32xf32>
    %296 = math.tanh %295 : vector<2x32xf32>
    %c504 = arith.constant 504 : index
    %c0_106 = arith.constant 0 : index
    %297 = vector.load %arg3[%c504, %c0_106] : memref<544x128xf32, #tpu.memory_space<vmem>>, vector<32x128xf32>
    %cst_107 = arith.constant dense<0.000000e+00> : vector<2x128xf32>
    %298 = tpu.matmul %296, %297, %cst_107 {dimension_numbers = #tpu.dot_dimension_numbers<[1], [0], [0], [1], [0, 0, 1, 1], [], []>} : vector<2x32xf32>, vector<32x128xf32>, vector<2x128xf32> -> vector<2x128xf32>
    %c536 = arith.constant 536 : index
    %c0_108 = arith.constant 0 : index
    %299 = vector.load %arg3[%c536, %c0_108] : memref<544x128xf32, #tpu.memory_space<vmem>>, vector<1x128xf32>
    %300 = vector.broadcast %299 : vector<1x128xf32> to vector<2x128xf32>
    %301 = arith.addf %298, %300 : vector<2x128xf32>
    %cst_109 = arith.constant dense<0xFF800000> : vector<2xf32>
    %302 = vector.multi_reduction <maximumf>, %301, %cst_109 [1] : vector<2x128xf32> to vector<2xf32>
    %303 = vector.shape_cast %302 : vector<2xf32> to vector<2x1xf32>
    %304 = vector.broadcast %303 : vector<2x1xf32> to vector<2x128xf32>
    %305 = arith.subf %301, %304 : vector<2x128xf32>
    %306 = math.exp %305 : vector<2x128xf32>
    %cst_110 = arith.constant dense<0.000000e+00> : vector<2xf32>
    %307 = vector.multi_reduction <add>, %306, %cst_110 [1] : vector<2x128xf32> to vector<2xf32>
    %308 = vector.shape_cast %307 : vector<2xf32> to vector<2x1xf32>
    %309 = math.log %308 : vector<2x1xf32>
    %310 = arith.addf %309, %303 : vector<2x1xf32>
    %311 = vector.broadcast %310 : vector<2x1xf32> to vector<2x128xf32>
    %312 = arith.subf %301, %311 : vector<2x128xf32>
    %313 = tpu.iota {dimensions = array<i32: 1>} : vector<1x128xi32>
    %cst_111 = arith.constant 0.000000e+00 : f32
    %314 = vector.broadcast %cst_111 : f32 to vector<1x1xf32>
    %c0_112 = arith.constant 0 : index
    %315 = memref.load %arg2[%c0_112] : memref<2xi32, #tpu.memory_space<smem>>
    %316 = vector.broadcast %315 : i32 to vector<1x128xi32>
    %317 = arith.cmpi eq, %313, %316 : vector<1x128xi32>
    %318 = arith.extui %317 : vector<1x128xi1> to vector<1x128xi32>
    %319 = arith.sitofp %318 : vector<1x128xi32> to vector<1x128xf32>
    %320 = vector.extract_strided_slice %312 {offsets = [0, 0], sizes = [1, 128], strides = [1, 1]} : vector<2x128xf32> to vector<1x128xf32>
    %321 = arith.mulf %319, %320 : vector<1x128xf32>
    %cst_113 = arith.constant dense<0.000000e+00> : vector<1xf32>
    %322 = vector.multi_reduction <add>, %321, %cst_113 [1] : vector<1x128xf32> to vector<1xf32>
    %323 = vector.shape_cast %322 : vector<1xf32> to vector<1x1xf32>
    %324 = arith.subf %314, %323 : vector<1x1xf32>
    %c1_114 = arith.constant 1 : index
    %325 = memref.load %arg2[%c1_114] : memref<2xi32, #tpu.memory_space<smem>>
    %326 = vector.broadcast %325 : i32 to vector<1x128xi32>
    %327 = arith.cmpi eq, %313, %326 : vector<1x128xi32>
    %328 = arith.extui %327 : vector<1x128xi1> to vector<1x128xi32>
    %329 = arith.sitofp %328 : vector<1x128xi32> to vector<1x128xf32>
    %330 = vector.extract_strided_slice %312 {offsets = [1, 0], sizes = [1, 128], strides = [1, 1]} : vector<2x128xf32> to vector<1x128xf32>
    %331 = arith.mulf %329, %330 : vector<1x128xf32>
    %cst_115 = arith.constant dense<0.000000e+00> : vector<1xf32>
    %332 = vector.multi_reduction <add>, %331, %cst_115 [1] : vector<1x128xf32> to vector<1xf32>
    %333 = vector.shape_cast %332 : vector<1xf32> to vector<1x1xf32>
    %334 = arith.subf %324, %333 : vector<1x1xf32>
    %cst_116 = arith.constant 5.000000e-01 : f32
    %335 = vector.broadcast %cst_116 : f32 to vector<1x1xf32>
    %336 = arith.mulf %334, %335 : vector<1x1xf32>
    %337 = vector.shape_cast %336 : vector<1x1xf32> to vector<1x1xf32>
    %338 = vector.broadcast %337 : vector<1x1xf32> to vector<1x128xf32>
    %cst_117 = arith.constant 0.000000e+00 : f32
    %339 = vector.broadcast %cst_117 : f32 to vector<5x128xf32>
    %340 = tpu.concatenate %301, %338, %339 in 0 : vector<2x128xf32>, vector<1x128xf32>, vector<5x128xf32> -> vector<8x128xf32>
    %c0_118 = arith.constant 0 : index
    %c0_119 = arith.constant 0 : index
    %341 = vector.load %arg5[%c0_118, %c0_119] : memref<8x128xf32, #tpu.memory_space<vmem>>, vector<8x128xf32>
    tpu.vector_store %arg5[%c0_118, %c0_119], %340 {strides = array<i32>} : memref<8x128xf32, #tpu.memory_space<vmem>>, vector<8x128xf32>,
    return
  }
}

</mosaic_0001>

<bundles_post_ra>
// kernel: model_forward.1
= control target key start
LH: loop header
LB: loop body
LE: loop exit
PB: predicated region body
PF: predicated region fallthrough
CT: control target
= control target key end

     0   :  { %11 = vsyncpa [#allocation4], 0  ;;  %s2197_s0 = inlined_call_operand.vmem [shape: f32[16,32], index: 0, kind: input, shape index: {}]   ;;  %s2198_s1 = inlined_call_operand.vmem [shape: f32[2,8], index: 1, kind: input, shape index: {}]   ;;  %s2199_s2 = inlined_call_operand.vmem [shape: s32[2], index: 2, kind: input, shape index: {}]   ;;  %s2200_s3 = inlined_call_operand.hbm [shape: f32[544,128], index: 3, kind: input, shape index: {}]   ;;  %s2201_s4 = inlined_call_operand.vmem [shape: f32[3,16,32], index: 4, kind: output, shape index: {0}]   ;;  %s2202_s5 = inlined_call_operand.vmem [shape: f32[8,128], index: 5, kind: output, shape index: {1}]  }
   0x1   :  { %s22_s20 = sshll.u32 %s2199_s2, 4  ;;  %s23_s20 = int_to_ptr.vmem [resolvable:$true] %s22_s20 }
   0x2   :  { %12 = vsyncpa [#allocation3], 0  ;;  %s30_s23 = sshll.u32 %s2200_s3, 4  ;;  %s1840_s24 = smov [#allocation2]   ;;  %s31_s23 = int_to_ptr.hbm [resolvable:$true] %s30_s23 }
   0x3   :  { %25 = dma.vmem_to_smem %s23_s20, 16, %s1840_s24, [#allocation4]  }
   0x4   :  { %s1841_s25 = smov [#allocation5]   ;;  %s1842_s27 = smov 128  }
   0x5   :  { %s32_s26 = sshll.u32 %s1841_s25, 4  ;;  %s1843_s28 = smov 8   ;;  %s33_s26 = int_to_ptr.vmem [resolvable:$true] %s32_s26 }
   0x6   :  { %38 = dma.hbm_to_vmem [thread:$0]  %s31_s23, 8704, %s33_s26, [#allocation3], %s1842_s27, %s1842_s27, %s1843_s28  }
   0x7   :  { %1836 = dma.done.wait [#allocation4], 16  }
   0x8   :  { %1837 = vsyncadd [#allocation4], 4294967280 }
   0x9   :  { %1838 = dma.done.wait [#allocation3], 8704  }
   0xa   :  { %1839 = vsyncadd [#allocation3], 4294958592 }
   0xb   :  { %47 = sfence }
   0xc   :  { %v48_v0 = vld [vmem:[%s2197_s0] sm:$0xff]  ;;  %vm52_vm0 = vcmask 261120   ;;  %v49_v2 = vld [vmem:[%s2197_s0 + $0x8] sm:$0xff]  ;;  %v1844_v4 = vmov 32.0   ;;  %v120_v23 = vld [vmem:[#allocation5 + $0x18] sm:$0xff]  ;;  %s1845_s9 = smov 80  }
   0xd   :  { %v53_v1 = vsel %vm52_vm0, %v48_v0, 0.0  ;;  %v56_v3 = vsel %vm52_vm0, %v49_v2, 0.0  ;;  %1732 = vrcp.f32 %v1844_v4  ;;  %v122_v21 = vld [vmem:[#allocation5 + $0x28] sm:$0xff]  ;;  %v121_v22 = vld [vmem:[#allocation5 + $0x20] sm:$0xff]  ;;  %v119_v24 = vld [vmem:[#allocation5 + $0x10] sm:$0xff]  ;;  %s1846_s10 = smov 112  }
   0xe   :  { %54 = vadd.xlane.f32.xlu0 %v53_v1  ;;  %143 = vmatpush.msra.mxu0 %v122_v21  ;;  %v1712_v39 = vld [vmem:[#allocation5] ss:$0 sm:$0xff]  ;;  %v1713_v43 = vld [vmem:[#allocation5 + $0x8] ss:$0 sm:$0xff]  ;;  %v1714_v53 = vld [vmem:[#allocation5 + $0x30] ss:$0 sm:$0xff] }
   0xf   :  { %s1847_s11 = smov 96   ;;  %vm161_vm8 = vcmask 130048   ;;  %vm217_vm9 = vcmask 64512   ;;  %s1849_s14 = smov 48  }
  0x10   :  { %144 = vmatpush.msra.mxu0 %v121_v22  ;;  %s1586_s23 = sld [smem:[#allocation2]] }
  0x12   :  { %145 = vmatpush.msra.mxu0 %v120_v23 }
  0x13   :  { %v1733_v5 = vpop.eup %1732 }
  0x14   :  { %v60_v6 = vmul.f32 32.0, %v1733_v5  ;;  %vm64_vm1 = vweird.f32 %v1733_v5  ;;  %146 = vmatpush.msra.mxu0 %v119_v24 }
  0x16   :  { %57 = vadd.xlane.f32.xlu0 %v56_v3  ;;  %v61_v7 = vsub.f32 1.0, %v60_v6 }
  0x18   :  { %v62_v8 = vmul.f32 %v1733_v5, %v61_v7 }
  0x1a   :  { %v63_v9 = vadd.f32 %v1733_v5, %v62_v8 }
  0x1c   :  { %v1896_v10 = vsel %vm64_vm1, %v1733_v5, %v63_v9 }
  0x81   :  { %v55_v11 = vpop.xlane.xlu0 %54 }
  0x82   :  { %v66_v12 = vmul.f32 %v1896_v10, %v55_v11 }
  0x84   :  { %v68_v13 = vsub.f32 %v48_v0, %v66_v12  ;;  %v112_v0 = vld [vmem:[%s2198_s1] sm:$0x3]  ;;  %s1848_s1 = smov 64  }
  0x85   :  { %v114_v1 = vrot.slane %v112_v0, 1  ;;  %v1947_v5 = vperm.slane %v112_v0, 0 }
  0x86   :  { %v70_v14 = vmul.f32 %v68_v13, %v68_v13 }
  0x88   :  { %v72_v15 = vsel %vm52_vm0, %v70_v14, 0.0 }
  0x89   :  { %73 = vadd.xlane.f32.xlu1 %v72_v15  ;;  %v58_v16 = vpop.xlane.xlu0 %57 }
  0x8a   :  { %v67_v17 = vmul.f32 %v1896_v10, %v58_v16 }
  0x8c   :  { %v69_v18 = vsub.f32 %v49_v2, %v67_v17  ;;  %v1945_v2 = vperm.slane %v114_v1, 0 }
  0x8e   :  { %v71_v19 = vmul.f32 %v69_v18, %v69_v18 }
  0x90   :  { %v75_v20 = vsel %vm52_vm0, %v71_v19, 0.0 }
  0x91   :  { %76 = vadd.xlane.f32.xlu1 %v75_v20 }
  0xfc   :  { %v74_v25 = vpop.xlane.xlu1 %73 }
  0xfd   :  { %v78_v26 = vmul.f32 %v74_v25, %v1896_v10 }
  0xff   :  { %v80_v27 = vadd.f32 1e-05, %v78_v26 }
 0x101   :  { %1734 = vrsqrt.f32 %v80_v27  ;;  %vm88_vm3 = vweird.f32 %v80_v27 }
 0x104   :  { %v77_v28 = vpop.xlane.xlu1 %76 }
 0x105   :  { %v79_v29 = vmul.f32 %v77_v28, %v1896_v10 }
 0x107   :  { %v1735_v30 = vpop.eup %1734  ;;  %v81_v31 = vadd.f32 1e-05, %v79_v29 }
 0x108   :  { %v83_v32 = vmul.f32 %v1735_v30, %v80_v27  ;;  %vm89_vm2 = vweird.f32 %v1735_v30 }
 0x109   :  { %1736 = vrsqrt.f32 %v81_v31  ;;  %vm90_vm4 = vmor %vm88_vm3, %vm89_vm2  ;;  %vm98_vm6 = vweird.f32 %v81_v31 }
 0x10a   :  { %v84_v33 = vmul.f32 %v1735_v30, %v83_v32 }
 0x10c   :  { %v85_v34 = vmul.f32 0.5, %v84_v33 }
 0x10e   :  { %v86_v35 = vsub.f32 1.5, %v85_v34 }
 0x10f   :  { %v1737_v36 = vpop.eup %1736 }
 0x110   :  { %v87_v37 = vmul.f32 %v1735_v30, %v86_v35  ;;  %v93_v38 = vmul.f32 %v1737_v36, %v81_v31  ;;  %vm99_vm5 = vweird.f32 %v1737_v36 }
 0x111   :  { %vm100_vm7 = vmor %vm98_vm6, %vm99_vm5 }
 0x112   :  { %v91_v40 = vsel %vm90_vm4, %v1735_v30, %v87_v37  ;;  %v94_v41 = vmul.f32 %v1737_v36, %v93_v38 }
 0x113   :  { %v102_v42 = vmul.f32 %v91_v40, %v68_v13 }
 0x114   :  { %v95_v44 = vmul.f32 0.5, %v94_v41 }
 0x115   :  { %v105_v45 = vmul.f32 %v1712_v39, %v102_v42 }
 0x116   :  { %v96_v46 = vsub.f32 1.5, %v95_v44 }
 0x117   :  { %v1904_v47 = vadd.f32 %v1713_v43, %v105_v45 }
 0x118   :  { %v97_v48 = vmul.f32 %v1737_v36, %v96_v46 }
 0x119   :  { %110 = vst.msk [vmem:[%s2201_s4] sm:$0xff] %vm52_vm0, %v1904_v47  ;;  %1631 = vmatmul.msk.f32.vlgmr.msra.gmra.mxu0 %vm52_vm0, %v1904_v47 }
 0x11a   :  { %v101_v49 = vsel %vm100_vm7, %v1737_v36, %v97_v48 }
 0x11b   :  { %v103_v50 = vmul.f32 %v101_v49, %v69_v18 }
 0x11d   :  { %v106_v51 = vmul.f32 %v1712_v39, %v103_v50 }
 0x11f   :  { %v1913_v52 = vadd.f32 %v1713_v43, %v106_v51 }
 0x121   :  { %111 = vst.msk [vmem:[%s2201_s4 + $0x8] sm:$0xff] %vm52_vm0, %v1913_v52  ;;  %1632 = vmatmul.msk.f32.gmra.mxu0 %vm52_vm0, %v1913_v52 }
 0x196   :  { %v148_v54 = vpop.f32.mrf.mxu0 }
 0x197   :  { %v1922_v55 = vadd.f32 %v1714_v53, %v148_v54 }
 0x199   :  { %320 = vrot.lane.b32.xlu0 %v1922_v55, %s1845_s9  ;;  %318 = vrot.lane.b32.xlu1 %v1922_v55, %s1846_s10 }
 0x19e   :  { %v151_v56 = vpop.f32.mrf.mxu0 }
 0x19f   :  { %v152_v57 = vadd.f32 %v1714_v53, %v151_v56 }
 0x1a1   :  { %187 = vrot.lane.b32.xlu2 %v152_v57, %s1847_s11 }
 0x1a9   :  { %159 = vrot.lane.b32.xlu2 %v1922_v55, %s1847_s11 }
 0x1b1   :  { %348 = vrot.lane.b32.xlu2 %v152_v57, %s1845_s9 }
 0x1b9   :  { %346 = vrot.lane.b32.xlu2 %v152_v57, %s1846_s10 }
 0x1fb   :  { %v188_v58 = vpop.permute.xlu2 %187 }
 0x1fc   :  { %1635 = vmatpush.xpose.msk.msra.mxu2 %vm161_vm8, %v188_v58 }
 0x1ff   :  { %1636 = vmatmul.msk.f32.vlgmr.msra.gmra.mxu2 %vm161_vm8, %v152_v57 }
 0x203   :  { %v160_v59 = vpop.permute.xlu2 %159 }
 0x204   :  { %1633 = vmatpush.xpose.msk.msra.mxu1 %vm161_vm8, %v160_v59 }
 0x207   :  { %1634 = vmatmul.msk.f32.vlgmr.msra.gmra.mxu1 %vm161_vm8, %v1922_v55 }
 0x20b   :  { %v349_v60 = vpop.permute.xlu2 %348  ;;  %v321_v61 = vpop.permute.xlu0 %320 }
 0x20c   :  { %1641 = vmatpush.xpose.msk.msrb.mxu2 %vm161_vm8, %v349_v60  ;;  %1639 = vmatpush.xpose.msk.msrb.mxu1 %vm161_vm8, %v321_v61  ;;  %v319_v62 = vpop.permute.xlu1 %318 }
 0x20f   :  { %1640 = vmatmul.msk.f32.vlgmr.msrb.gmra.mxu1 %vm161_vm8, %v319_v62 }
 0x213   :  { %v347_v63 = vpop.permute.xlu2 %346 }
 0x214   :  { %1642 = vmatmul.msk.f32.vlgmr.msrb.gmra.mxu2 %vm161_vm8, %v347_v63 }
 0x282   :  { %v210_v3 = vpop.f32.mrf.mxu2 }
 0x283   :  { %v214_v4 = vmul.f32 0.25, %v210_v3 }
 0x284   :  { %v183_v6 = vpop.f32.mrf.mxu1 }
 0x285   :  { %v213_v7 = vmul.f32 0.25, %v183_v6  ;;  %v216_v8 = vadd.f32 %v214_v4, %v1945_v2 }
 0x287   :  { %v221_v9 = vsel %vm217_vm9, %v216_v8, -inf  ;;  %v215_v11 = vadd.f32 %v213_v7, %v1947_v5 }
 0x288   :  { %222 = vmax.xlane.f32.xlu2 %v221_v9 }
 0x289   :  { %v218_v12 = vsel %vm217_vm9, %v215_v11, -inf }
 0x28a   :  { %219 = vmax.xlane.f32.xlu1 %v218_v12 }
 0x28c   :  { %v343_v13 = vpop.f32.mrf.mxu1 }
 0x28d   :  { %v374_v14 = vmul.f32 0.25, %v343_v13 }
 0x28f   :  { %v376_v15 = vadd.f32 %v374_v14, %v1947_v5 }
 0x291   :  { %v378_v16 = vsel %vm217_vm9, %v376_v15, -inf }
 0x292   :  { %379 = vmax.xlane.f32.xlu0 %v378_v16 }
 0x297   :  { %v371_v17 = vpop.f32.mrf.mxu2 }
 0x298   :  { %v375_v18 = vmul.f32 0.25, %v371_v17 }
 0x29a   :  { %v377_v19 = vadd.f32 %v375_v18, %v1945_v2 }
 0x29c   :  { %v381_v20 = vsel %vm217_vm9, %v377_v19, -inf }
 0x29d   :  { %382 = vmax.xlane.f32.xlu2 %v381_v20 }
 0x2a3   :  { %292 = vrot.lane.b32.xlu1 %v152_v57, %s1848_s1 }
 0x2ab   :  { %452 = vrot.lane.b32.xlu1 %v152_v57, %s1849_s14 }
 0x2fb   :  { %v223_v21 = vpop.xlane.xlu2 %222 }
 0x2fc   :  { %v225_v24 = vsub.f32 %v216_v8, %v223_v21 }
 0x2fd   :  { %v220_v22 = vpop.xlane.xlu1 %219 }
 0x2fe   :  { %v224_v23 = vsub.f32 %v215_v11, %v220_v22  ;;  %v228_v26 = vmul.f32 1.442695, %v225_v24 }
 0x300   :  { %v226_v25 = vmul.f32 1.442695, %v224_v23  ;;  %v155_v23 = vld [vmem:[#allocation5 + $0x40] sm:$0xff] }
 0x302   :  { %1738 = vpow2.f32 %v226_v25 }
 0x303   :  { %1740 = vpow2.f32 %v228_v26 }
 0x305   :  { %v380_v27 = vpop.xlane.xlu0 %379 }
 0x306   :  { %v384_v28 = vsub.f32 %v376_v15, %v380_v27 }
 0x308   :  { %v1959_v29 = vpop.eup %1738  ;;  %v386_v30 = vmul.f32 1.442695, %v384_v28 }
 0x309   :  { %v230_v31 = vsel %vm217_vm9, %v1959_v29, 0.0  ;;  %v1963_v32 = vpop.eup %1740 }
 0x30a   :  { %231 = vadd.xlane.f32.xlu0 %v230_v31  ;;  %1742 = vpow2.f32 %v386_v30  ;;  %v233_v36 = vsel %vm217_vm9, %v1963_v32, 0.0 }
 0x310   :  { %v383_v33 = vpop.xlane.xlu2 %382  ;;  %v1965_v34 = vpop.eup %1742 }
 0x311   :  { %v385_v35 = vsub.f32 %v377_v19, %v383_v33  ;;  %v390_v37 = vsel %vm217_vm9, %v1965_v34, 0.0 }
 0x312   :  { %234 = vadd.xlane.f32.xlu0 %v233_v36  ;;  %391 = vadd.xlane.f32.xlu2 %v390_v37 }
 0x313   :  { %v388_v38 = vmul.f32 1.442695, %v385_v35 }
 0x315   :  { %1744 = vpow2.f32 %v388_v38  ;;  %v293_v39 = vpop.permute.xlu1 %292  ;;  %v154_v38 = vld [vmem:[#allocation5 + $0x38] sm:$0xff] }
 0x316   :  { %313 = vmatpush.msra.mxu3 %v293_v39  ;;  %v157_v39 = vld [vmem:[#allocation5 + $0x50] sm:$0xff] }
 0x317   :  { %498 = vmatpush.msra.mxu2 %v157_v39  ;;  %v1718_v39 = vld [vmem:[#allocation5 + $0x90] ss:$0 sm:$0xff] }
 0x31b   :  { %v1971_v40 = vpop.eup %1744 }
 0x31c   :  { %v393_v41 = vsel %vm217_vm9, %v1971_v40, 0.0 }
 0x31d   :  { %v453_v42 = vpop.permute.xlu1 %452  ;;  %394 = vadd.xlane.f32.xlu2 %v393_v41  ;;  %v156_v41 = vld [vmem:[#allocation5 + $0x48] sm:$0xff] }
 0x31e   :  { %473 = vmatpush.msra.mxu1 %v453_v42  ;;  %499 = vmatpush.msra.mxu2 %v156_v41 }
 0x326   :  { %426 = vrot.lane.b32.xlu0 %v1922_v55, %s1849_s14 }
 0x335   :  { %266 = vrot.lane.b32.xlu2 %v1922_v55, %s1848_s1 }
 0x37d   :  { %v232_v43 = vpop.xlane.xlu0 %231 }
 0x37e   :  { %1746 = vrcp.f32 %v232_v43  ;;  %vm241_vm11 = vweird.f32 %v232_v43  ;;  %v247_v58 = vand.u32 2147483648, %v232_v43  ;;  %v245_v55 = vand.u32 2147483647, %v232_v43 }
 0x380   :  { %v248_v6 = vor.u32 1.1754944e-38, %v247_v58  ;;  %vm246_vm15 = vcmp.eq.f32.partialorder %v245_v55, 8.507059e+37 }
 0x384   :  { %v1747_v44 = vpop.eup %1746 }
 0x385   :  { %v237_v45 = vmul.f32 %v1747_v44, %v232_v43  ;;  %v235_v46 = vpop.xlane.xlu0 %234  ;;  %v392_v48 = vpop.xlane.xlu2 %391  ;;  %vm242_vm10 = vweird.f32 %v1747_v44 }
 0x386   :  { %1748 = vrcp.f32 %v235_v46  ;;  %v262_v61 = vand.u32 2147483648, %v235_v46  ;;  %v260_v63 = vand.u32 2147483647, %v235_v46  ;;  %vm1979_vm12 = vmor %vm241_vm11, %vm242_vm10  ;;  %vm256_vm14 = vweird.f32 %v235_v46 }
 0x387   :  { %v238_v49 = vsub.f32 1.0, %v237_v45  ;;  %1750 = vrcp.f32 %v392_v48  ;;  %v407_v13 = vand.u32 2147483648, %v392_v48  ;;  %vm401_vm4 = vweird.f32 %v392_v48  ;;  %v1715_v45 = vld [vmem:[#allocation5 + $0x58] ss:$0 sm:$0xff] }
 0x388   :  { %v263_v8 = vor.u32 1.1754944e-38, %v262_v61  ;;  %vm261_vm2 = vcmp.eq.f32.partialorder %v260_v63, 8.507059e+37  ;;  %v405_v16 = vand.u32 2147483647, %v392_v48 }
 0x389   :  { %v239_v50 = vmul.f32 %v1747_v44, %v238_v49  ;;  %v408_v25 = vor.u32 1.1754944e-38, %v407_v13 }
 0x38a   :  { %vm406_vm6 = vcmp.eq.f32.partialorder %v405_v16, 8.507059e+37 }
 0x38b   :  { %v240_v56 = vadd.f32 %v1747_v44, %v239_v50 }
 0x38c   :  { %v1749_v51 = vpop.eup %1748 }
 0x38d   :  { %v1751_v53 = vpop.eup %1750  ;;  %v252_v54 = vmul.f32 %v1749_v51, %v235_v46  ;;  %vm257_vm13 = vweird.f32 %v1749_v51  ;;  %v244_v4 = vsel %vm1979_vm12, %v1747_v44, %v240_v56 }
 0x38e   :  { %v397_v57 = vmul.f32 %v1751_v53, %v392_v48  ;;  %vm258_vm1 = vmor %vm256_vm14, %vm257_vm13  ;;  %vm402_vm3 = vweird.f32 %v1751_v53  ;;  %v249_v12 = vsel %vm246_vm15, %v248_v6, %v244_v4  ;;  %v596_v6 = vld [vmem:[#allocation5 + $0x80] sm:$0xff] }
 0x38f   :  { %v253_v59 = vsub.f32 1.0, %v252_v54  ;;  %vm1986_vm5 = vmor %vm401_vm4, %vm402_vm3  ;;  %v250_v22 = vmul.f32 %v1959_v29, %v249_v12 }
 0x390   :  { %v398_v60 = vsub.f32 1.0, %v397_v57  ;;  %v395_v62 = vpop.xlane.xlu2 %394 }
 0x391   :  { %v254_v1 = vmul.f32 %v1749_v51, %v253_v59  ;;  %1752 = vrcp.f32 %v395_v62  ;;  %v422_v27 = vand.u32 2147483648, %v395_v62  ;;  %v420_v30 = vand.u32 2147483647, %v395_v62 }
 0x392   :  { %v399_v3 = vmul.f32 %v1751_v53, %v398_v60  ;;  %vm416_vm10 = vweird.f32 %v395_v62 }
 0x393   :  { %v255_v7 = vadd.f32 %v1749_v51, %v254_v1  ;;  %vm421_vm12 = vcmp.eq.f32.partialorder %v420_v30, 8.507059e+37 }
 0x394   :  { %v400_v9 = vadd.f32 %v1751_v53, %v399_v3 }
 0x395   :  { %v259_v11 = vsel %vm258_vm1, %v1749_v51, %v255_v7  ;;  %v595_v7 = vld [vmem:[#allocation5 + $0x78] sm:$0xff] }
 0x396   :  { %v264_v14 = vsel %vm261_vm2, %v263_v8, %v259_v11  ;;  %v404_v24 = vsel %vm1986_vm5, %v1751_v53, %v400_v9  ;;  %v594_v8 = vld [vmem:[#allocation5 + $0x70] sm:$0xff] }
 0x397   :  { %v1753_v15 = vpop.eup %1752  ;;  %v265_v17 = vmul.f32 %v1963_v32, %v264_v14  ;;  %v409_v31 = vsel %vm406_vm6, %v408_v25, %v404_v24  ;;  %v423_v32 = vor.u32 1.1754944e-38, %v422_v27  ;;  %v1716_v24 = vld [vmem:[#allocation5 + $0x60] ss:$0 sm:$0xff] }
 0x398   :  { %v412_v19 = vmul.f32 %v1753_v15, %v395_v62  ;;  %v267_v20 = vpop.permute.xlu2 %266  ;;  %v427_v21 = vpop.permute.xlu0 %426  ;;  %vm417_vm7 = vweird.f32 %v1753_v15  ;;  %v410_v33 = vmul.f32 %v1965_v34, %v409_v31 }
 0x399   :  { %287 = vmatpush.msrb.mxu0 %v267_v20  ;;  %1638 = vmatmul.msk.f32.vlgmr.msra.gmra.mxu3 %vm217_vm9, %v265_v17  ;;  %vm418_vm11 = vmor %vm416_vm10, %vm417_vm7 }
 0x39a   :  { %v413_v26 = vsub.f32 1.0, %v412_v19  ;;  %447 = vmatpush.msrb.mxu3 %v427_v21  ;;  %1637 = vmatmul.msk.f32.vlgmr.msrb.gmra.mxu0 %vm217_vm9, %v250_v22 }
 0x39b   :  { %527 = vmatpush.msra.mxu0 %v155_v23 }
 0x39c   :  { %v414_v28 = vmul.f32 %v1753_v15, %v413_v26 }
 0x39d   :  { %528 = vmatpush.msra.mxu0 %v154_v38 }
 0x39e   :  { %v415_v29 = vadd.f32 %v1753_v15, %v414_v28  ;;  %v1717_v28 = vld [vmem:[#allocation5 + $0x68] ss:$0 sm:$0xff] }
 0x3a0   :  { %v419_v35 = vsel %vm418_vm11, %v1753_v15, %v415_v29 }
 0x3a1   :  { %v424_v36 = vsel %vm421_vm12, %v423_v32, %v419_v35  ;;  %1643 = vmatmul.msk.f32.vlgmr.msrb.gmra.mxu3 %vm217_vm9, %v410_v33  ;;  %vm727_vm12 = vcmask 523264  }
 0x3a2   :  { %v425_v37 = vmul.f32 %v1971_v40, %v424_v36 }
 0x3a4   :  { %1644 = vmatmul.msk.f32.vlgmr.msra.gmra.mxu1 %vm217_vm9, %v425_v37 }
 0x417   :  { %v289_v42 = vpop.f32.mrf.mxu0 }
 0x418   :  { %1647 = vmatmul.msk.f32.vlgmr.msra.gmra.mxu0 %vm161_vm8, %v289_v42 }
 0x41c   :  { %v315_v43 = vpop.f32.mrf.mxu3 }
 0x420   :  { %1648 = vmatmul.msk.f32.gmra.mxu0 %vm161_vm8, %v315_v43 }
 0x421   :  { %v475_v44 = vpop.f32.mrf.mxu1 }
 0x424   :  { %v449_v34 = vpop.f32.mrf.mxu3 }
 0x425   :  { %1645 = vmatmul.msk.f32.vlgmr.msra.gmra.mxu2 %vm161_vm8, %v449_v34 }
 0x42d   :  { %1646 = vmatmul.msk.f32.gmra.mxu2 %vm161_vm8, %v475_v44 }
 0x495   :  { %v530_v40 = vpop.f32.mrf.mxu0 }
 0x49d   :  { %v533_v53 = vpop.f32.mrf.mxu0 }
 0x4a8   :  { %v501_v46 = vpop.f32.mrf.mxu2 }
 0x4a9   :  { %v531_v48 = vadd.f32 %v530_v40, %v501_v46 }
 0x4ab   :  { %v538_v49 = vadd.f32 %v1715_v45, %v531_v48 }
 0x4ad   :  { %v540_v50 = vadd.f32 %v538_v49, %v1904_v47 }
 0x4af   :  { %v544_v51 = vsel %vm52_vm0, %v540_v50, 0.0 }
 0x4b0   :  { %545 = vadd.xlane.f32.xlu0 %v544_v51  ;;  %v504_v54 = vpop.f32.mrf.mxu2 }
 0x4b1   :  { %v534_v56 = vadd.f32 %v533_v53, %v504_v54 }
 0x4b3   :  { %v539_v57 = vadd.f32 %v1715_v45, %v534_v56  ;;  %v724_v45 = vld [vmem:[#allocation5 + $0xd0] sm:$0xff]  ;;  %v722_v56 = vld [vmem:[#allocation5 + $0xc0] sm:$0xff] }
 0x4b4   :  { %742 = vmatpush.msrb.mxu1 %v724_v45 }
 0x4b5   :  { %v541_v58 = vadd.f32 %v539_v57, %v1913_v52  ;;  %v597_v52 = vld [vmem:[#allocation5 + $0x88] sm:$0xff] }
 0x4b6   :  { %618 = vmatpush.msra.mxu3 %v597_v52 }
 0x4b7   :  { %v547_v59 = vsel %vm52_vm0, %v541_v58, 0.0 }
 0x4b8   :  { %548 = vadd.xlane.f32.xlu1 %v547_v59  ;;  %619 = vmatpush.msra.mxu3 %v596_v6 }
 0x4ba   :  { %620 = vmatpush.msra.mxu3 %v595_v7 }
 0x4bc   :  { %621 = vmatpush.msra.mxu3 %v594_v8  ;;  %v718_v8 = vld [vmem:[#allocation5 + $0xa0] sm:$0xff] }
 0x523   :  { %v546_v55 = vpop.xlane.xlu0 %545 }
 0x524   :  { %v550_v60 = vmul.f32 %v546_v55, %v1896_v10  ;;  %v721_v55 = vld [vmem:[#allocation5 + $0xb8] sm:$0xff] }
 0x526   :  { %v552_v61 = vsub.f32 %v540_v50, %v550_v60  ;;  %v723_v50 = vld [vmem:[#allocation5 + $0xc8] sm:$0xff] }
 0x527   :  { %743 = vmatpush.msrb.mxu1 %v723_v50 }
 0x528   :  { %v554_v62 = vmul.f32 %v552_v61, %v552_v61 }
 0x529   :  { %744 = vmatpush.msrb.mxu1 %v722_v56 }
 0x52a   :  { %v556_v63 = vsel %vm52_vm0, %v554_v62, 0.0 }
 0x52b   :  { %557 = vadd.xlane.f32.xlu2 %v556_v63  ;;  %v549_v47 = vpop.xlane.xlu1 %548  ;;  %745 = vmatpush.msrb.mxu1 %v721_v55  ;;  %v720_v63 = vld [vmem:[#allocation5 + $0xb0] sm:$0xff] }
 0x52c   :  { %v551_v0 = vmul.f32 %v549_v47, %v1896_v10 }
 0x52d   :  { %746 = vmatpush.msrb.mxu1 %v720_v63 }
 0x52e   :  { %v553_v1 = vsub.f32 %v541_v58, %v551_v0 }
 0x530   :  { %v555_v3 = vmul.f32 %v553_v1, %v553_v1 }
 0x532   :  { %v559_v4 = vsel %vm52_vm0, %v555_v3, 0.0  ;;  %v719_v3 = vld [vmem:[#allocation5 + $0xa8] sm:$0xff] }
 0x533   :  { %560 = vadd.xlane.f32.xlu0 %v559_v4  ;;  %747 = vmatpush.msrb.mxu1 %v719_v3 }
 0x535   :  { %748 = vmatpush.msrb.mxu1 %v718_v8 }
 0x59e   :  { %v558_v9 = vpop.xlane.xlu2 %557 }
 0x59f   :  { %v562_v11 = vmul.f32 %v558_v9, %v1896_v10 }
 0x5a1   :  { %v564_v12 = vadd.f32 1e-05, %v562_v11 }
 0x5a3   :  { %1754 = vrsqrt.f32 %v564_v12  ;;  %vm572_vm14 = vweird.f32 %v564_v12 }
 0x5a6   :  { %v561_v13 = vpop.xlane.xlu0 %560 }
 0x5a7   :  { %v563_v14 = vmul.f32 %v561_v13, %v1896_v10  ;;  %v717_v13 = vld [vmem:[#allocation5 + $0x98] sm:$0xff] }
 0x5a8   :  { %749 = vmatpush.msrb.mxu1 %v717_v13 }
 0x5a9   :  { %v1755_v15 = vpop.eup %1754  ;;  %v565_v16 = vadd.f32 1e-05, %v563_v14 }
 0x5aa   :  { %v567_v17 = vmul.f32 %v1755_v15, %v564_v12  ;;  %vm573_vm13 = vweird.f32 %v1755_v15 }
 0x5ab   :  { %1756 = vrsqrt.f32 %v565_v16  ;;  %vm574_vm15 = vmor %vm572_vm14, %vm573_vm13  ;;  %vm582_vm2 = vweird.f32 %v565_v16 }
 0x5ac   :  { %v568_v18 = vmul.f32 %v1755_v15, %v567_v17 }
 0x5ae   :  { %v569_v19 = vmul.f32 0.5, %v568_v18 }
 0x5b0   :  { %v570_v20 = vsub.f32 1.5, %v569_v19 }
 0x5b1   :  { %v1757_v21 = vpop.eup %1756 }
 0x5b2   :  { %v571_v22 = vmul.f32 %v1755_v15, %v570_v20  ;;  %v577_v23 = vmul.f32 %v1757_v21, %v565_v16  ;;  %vm583_vm1 = vweird.f32 %v1757_v21 }
 0x5b3   :  { %vm584_vm3 = vmor %vm582_vm2, %vm583_vm1 }
 0x5b4   :  { %v575_v25 = vsel %vm574_vm15, %v1755_v15, %v571_v22  ;;  %v578_v26 = vmul.f32 %v1757_v21, %v577_v23 }
 0x5b5   :  { %v586_v27 = vmul.f32 %v575_v25, %v552_v61 }
 0x5b6   :  { %v579_v30 = vmul.f32 0.5, %v578_v26 }
 0x5b7   :  { %v589_v31 = vmul.f32 %v1716_v24, %v586_v27 }
 0x5b8   :  { %v580_v29 = vsub.f32 1.5, %v579_v30 }
 0x5b9   :  { %v2013_v32 = vadd.f32 %v1717_v28, %v589_v31 }
 0x5ba   :  { %v581_v33 = vmul.f32 %v1757_v21, %v580_v29 }
 0x5bb   :  { %1649 = vmatmul.msk.f32.vlgmr.msra.gmra.mxu3 %vm52_vm0, %v2013_v32 }
 0x5bc   :  { %v585_v35 = vsel %vm584_vm3, %v1757_v21, %v581_v33 }
 0x5bd   :  { %v587_v36 = vmul.f32 %v585_v35, %v553_v1 }
 0x5bf   :  { %v590_v37 = vmul.f32 %v1716_v24, %v587_v36 }
 0x5c1   :  { %v2017_v38 = vadd.f32 %v1717_v28, %v590_v37 }
 0x5c3   :  { %1650 = vmatmul.msk.f32.gmra.mxu3 %vm52_vm0, %v2017_v38 }
 0x63e   :  { %v623_v41 = vpop.f32.mrf.mxu3 }
 0x63f   :  { %v2021_v42 = vadd.f32 %v1718_v39, %v623_v41 }
 0x641   :  { %v2024_v43 = vmul.f32 0.70710677, %v2021_v42 }
 0x643   :  { %v633_v34 = vmul.f32 %v2024_v43, %v2024_v43 }
 0x645   :  { %v634_v44 = vmin.f32 %v633_v34, 16.0 }
 0x646   :  { %v626_v40 = vpop.f32.mrf.mxu3 }
 0x647   :  { %v635_v46 = vmul.f32 2.1237322e-06, %v634_v44  ;;  %v646_v48 = vmul.f32 3.8918573e-05, %v634_v44  ;;  %v2028_v49 = vadd.f32 %v1718_v39, %v626_v40 }
 0x649   :  { %v636_v51 = vadd.f32 0.00028619796, %v635_v46  ;;  %v647_v53 = vadd.f32 0.001143296, %v646_v48  ;;  %v2031_v54 = vmul.f32 0.70710677, %v2028_v49 }
 0x64a   :  { %v630_v8 = vmul.f32 0.5, %v2028_v49 }
 0x64b   :  { %v637_v57 = vmul.f32 %v636_v51, %v634_v44  ;;  %v648_v58 = vmul.f32 %v647_v53, %v634_v44  ;;  %v673_v59 = vmul.f32 %v2031_v54, %v2031_v54 }
 0x64d   :  { %v649_v60 = vadd.f32 0.014752088, %v648_v58  ;;  %v638_v61 = vadd.f32 0.0036580483, %v637_v57  ;;  %v674_v62 = vmin.f32 %v673_v59, 16.0 }
 0x64f   :  { %v650_v47 = vmul.f32 %v649_v60, %v634_v44  ;;  %v675_v0 = vmul.f32 2.1237322e-06, %v674_v62  ;;  %v686_v1 = vmul.f32 3.8918573e-05, %v674_v62  ;;  %v639_v52 = vmul.f32 %v638_v61, %v634_v44 }
 0x651   :  { %v651_v4 = vadd.f32 0.112945676, %v650_v47  ;;  %v676_v6 = vadd.f32 0.00028619796, %v675_v0  ;;  %v687_v7 = vadd.f32 0.001143296, %v686_v1 }
 0x652   :  { %v640_v15 = vadd.f32 0.05243302, %v639_v52  ;;  %v629_v47 = vmul.f32 0.5, %v2021_v42 }
 0x653   :  { %v652_v9 = vmul.f32 %v651_v4, %v634_v44  ;;  %v677_v11 = vmul.f32 %v676_v6, %v674_v62  ;;  %v688_v12 = vmul.f32 %v687_v7, %v674_v62 }
 0x654   :  { %v641_v21 = vmul.f32 %v640_v15, %v634_v44 }
 0x655   :  { %v653_v14 = vadd.f32 0.4994258, %v652_v9  ;;  %v689_v16 = vadd.f32 0.014752088, %v688_v12  ;;  %v678_v18 = vadd.f32 0.0036580483, %v677_v11 }
 0x656   :  { %v642_v25 = vadd.f32 0.18741608, %v641_v21  ;;  %v1719_v11 = vld [vmem:[#allocation5 + $0xd8] ss:$0 sm:$0xff] }
 0x657   :  { %v654_v17 = vmul.f32 %v653_v14, %v634_v44  ;;  %v690_v19 = vmul.f32 %v689_v16, %v674_v62  ;;  %v679_v23 = vmul.f32 %v678_v18, %v674_v62 }
 0x658   :  { %v643_v31 = vmul.f32 %v642_v25, %v634_v44 }
 0x659   :  { %v655_v20 = vadd.f32 1.0, %v654_v17  ;;  %v691_v22 = vadd.f32 0.112945676, %v690_v19  ;;  %v680_v27 = vadd.f32 0.05243302, %v679_v23 }
 0x65a   :  { %v644_v39 = vadd.f32 1.1283791, %v643_v31 }
 0x65b   :  { %1758 = vrcp.f32 %v655_v20  ;;  %v692_v24 = vmul.f32 %v691_v22, %v674_v62  ;;  %v681_v35 = vmul.f32 %v680_v27, %v674_v62  ;;  %v667_v37 = vand.u32 2147483648, %v655_v20  ;;  %v816_v27 = vld [vmem:[#allocation5 + $0x100] sm:$0xff] }
 0x65c   :  { %v665_v34 = vand.u32 2147483647, %v655_v20  ;;  %vm661_vm5 = vweird.f32 %v655_v20  ;;  %v645_v50 = vmul.f32 %v644_v39, %v2024_v43 }
 0x65d   :  { %v693_v26 = vadd.f32 0.4994258, %v692_v24  ;;  %v682_v40 = vadd.f32 0.18741608, %v681_v35  ;;  %v668_v46 = vor.u32 1.1754944e-38, %v667_v37 }
 0x65e   :  { %vm666_vm7 = vcmp.eq.f32.partialorder %v665_v34, 8.507059e+37 }
 0x65f   :  { %v694_v28 = vmul.f32 %v693_v26, %v674_v62  ;;  %v683_v53 = vmul.f32 %v682_v40, %v674_v62 }
 0x661   :  { %v1759_v30 = vpop.eup %1758  ;;  %v695_v33 = vadd.f32 1.0, %v694_v28  ;;  %v684_v60 = vadd.f32 1.1283791, %v683_v53  ;;  %v815_v28 = vld [vmem:[#allocation5 + $0xf8] sm:$0xff] }
 0x662   :  { %v657_v29 = vmul.f32 %v1759_v30, %v655_v20  ;;  %vm662_vm4 = vweird.f32 %v1759_v30 }
 0x663   :  { %1760 = vrcp.f32 %v695_v33  ;;  %vm663_vm6 = vmor %vm661_vm5, %vm662_vm4  ;;  %v707_v55 = vand.u32 2147483648, %v695_v33  ;;  %v705_v63 = vand.u32 2147483647, %v695_v33  ;;  %vm701_vm11 = vweird.f32 %v695_v33 }
 0x664   :  { %v658_v36 = vsub.f32 1.0, %v657_v29  ;;  %v685_v62 = vmul.f32 %v684_v60, %v2031_v54 }
 0x665   :  { %v708_v3 = vor.u32 1.1754944e-38, %v707_v55  ;;  %vm706_vm14 = vcmp.eq.f32.partialorder %v705_v63, 8.507059e+37 }
 0x666   :  { %v659_v41 = vmul.f32 %v1759_v30, %v658_v36 }
 0x668   :  { %v660_v45 = vadd.f32 %v1759_v30, %v659_v41 }
 0x669   :  { %v1761_v48 = vpop.eup %1760 }
 0x66a   :  { %v664_v51 = vsel %vm663_vm6, %v1759_v30, %v660_v45  ;;  %v697_v56 = vmul.f32 %v1761_v48, %v695_v33  ;;  %vm702_vm10 = vweird.f32 %v1761_v48  ;;  %v814_v30 = vld [vmem:[#allocation5 + $0xf0] sm:$0xff] }
 0x66b   :  { %v669_v44 = vsel %vm666_vm7, %v668_v46, %v664_v51  ;;  %vm703_vm13 = vmor %vm701_vm11, %vm702_vm10 }
 0x66c   :  { %v670_v57 = vmul.f32 %v669_v44, %v645_v50  ;;  %v698_v58 = vsub.f32 1.0, %v697_v56  ;;  %v1720_v50 = vld [vmem:[#allocation5 + $0xe0] ss:$0 sm:$0xff] }
 0x66e   :  { %v1651_v59 = vclamps-f32 %v670_v57, 1.0  ;;  %v699_v61 = vmul.f32 %v1761_v48, %v698_v58  ;;  %v1721_v57 = vld [vmem:[#allocation5 + $0xe8] ss:$0 sm:$0xff] }
 0x670   :  { %v713_v0 = vadd.f32 1.0, %v1651_v59  ;;  %v700_v1 = vadd.f32 %v1761_v48, %v699_v61 }
 0x672   :  { %v715_v43 = vmul.f32 %v713_v0, %v629_v47  ;;  %v704_v4 = vsel %vm703_vm13, %v1761_v48, %v700_v1 }
 0x673   :  { %v709_v52 = vsel %vm706_vm14, %v708_v3, %v704_v4 }
 0x674   :  { %1653 = vmatmul.msk.f32.vlgmr.msrb.gmra.mxu1 %vm727_vm12, %v715_v43  ;;  %v710_v6 = vmul.f32 %v709_v52, %v685_v62  ;;  %v1722_v43 = vld [vmem:[#allocation5 + $0x110] ss:$0 sm:$0xff] }
 0x676   :  { %v1652_v7 = vclamps-f32 %v710_v6, 1.0 }
 0x678   :  { %v714_v9 = vadd.f32 1.0, %v1652_v7 }
 0x67a   :  { %v716_v42 = vmul.f32 %v714_v9, %v630_v8 }
 0x67c   :  { %1654 = vmatmul.msk.f32.gmra.mxu1 %vm727_vm12, %v716_v42 }
 0x6f1   :  { %v751_v12 = vpop.f32.mrf.mxu1 }
 0x6f2   :  { %v752_v13 = vadd.f32 %v1719_v11, %v751_v12 }
 0x6f4   :  { %v757_v14 = vadd.f32 %v752_v13, %v2013_v32 }
 0x6f6   :  { %v761_v54 = vsel %vm52_vm0, %v757_v14, 0.0 }
 0x6f7   :  { %762 = vadd.xlane.f32.xlu1 %v761_v54 }
 0x6f9   :  { %v754_v15 = vpop.f32.mrf.mxu1 }
 0x6fa   :  { %v755_v16 = vadd.f32 %v1719_v11, %v754_v15 }
 0x6fc   :  { %v758_v17 = vadd.f32 %v755_v16, %v2017_v38  ;;  %v817_v38 = vld [vmem:[#allocation5 + $0x108] sm:$0xff] }
 0x6fd   :  { %838 = vmatpush.msrb.mxu2 %v817_v38 }
 0x6fe   :  { %v764_v18 = vsel %vm52_vm0, %v758_v17, 0.0 }
 0x6ff   :  { %765 = vadd.xlane.f32.xlu2 %v764_v18  ;;  %839 = vmatpush.msrb.mxu2 %v816_v27 }
 0x701   :  { %840 = vmatpush.msrb.mxu2 %v815_v28 }
 0x703   :  { %841 = vmatpush.msrb.mxu2 %v814_v30 }
 0x76a   :  { %v763_v49 = vpop.xlane.xlu1 %762 }
 0x76b   :  { %v767_v19 = vmul.f32 %v763_v49, %v1896_v10 }
 0x76d   :  { %v769_v20 = vsub.f32 %v757_v14, %v767_v19 }
 0x76f   :  { %v771_v21 = vmul.f32 %v769_v20, %v769_v20 }
 0x771   :  { %v773_v22 = vsel %vm52_vm0, %v771_v21, 0.0 }
 0x772   :  { %774 = vadd.xlane.f32.xlu0 %v773_v22  ;;  %v766_v23 = vpop.xlane.xlu2 %765 }
 0x773   :  { %v768_v32 = vmul.f32 %v766_v23, %v1896_v10 }
 0x775   :  { %v770_v24 = vsub.f32 %v758_v17, %v768_v32 }
 0x777   :  { %v772_v25 = vmul.f32 %v770_v24, %v770_v24 }
 0x779   :  { %v776_v26 = vsel %vm52_vm0, %v772_v25, 0.0 }
 0x77a   :  { %777 = vadd.xlane.f32.xlu1 %v776_v26 }
 0x7e5   :  { %v775_v31 = vpop.xlane.xlu0 %774 }
 0x7e6   :  { %v779_v29 = vmul.f32 %v775_v31, %v1896_v10 }
 0x7e8   :  { %v781_v33 = vadd.f32 1e-05, %v779_v29 }
 0x7ea   :  { %1762 = vrsqrt.f32 %v781_v33  ;;  %vm789_vm1 = vweird.f32 %v781_v33 }
 0x7ed   :  { %v778_v35 = vpop.xlane.xlu1 %777 }
 0x7ee   :  { %v780_v36 = vmul.f32 %v778_v35, %v1896_v10 }
 0x7f0   :  { %v1763_v37 = vpop.eup %1762  ;;  %v782_v41 = vadd.f32 1e-05, %v780_v36 }
 0x7f1   :  { %v784_v39 = vmul.f32 %v1763_v37, %v781_v33  ;;  %vm790_vm15 = vweird.f32 %v1763_v37 }
 0x7f2   :  { %1764 = vrsqrt.f32 %v782_v41  ;;  %vm791_vm2 = vmor %vm789_vm1, %vm790_vm15  ;;  %vm799_vm4 = vweird.f32 %v782_v41 }
 0x7f3   :  { %v785_v34 = vmul.f32 %v1763_v37, %v784_v39 }
 0x7f5   :  { %v786_v40 = vmul.f32 0.5, %v785_v34 }
 0x7f7   :  { %v787_v45 = vsub.f32 1.5, %v786_v40 }
 0x7f8   :  { %v1765_v46 = vpop.eup %1764 }
 0x7f9   :  { %v788_v48 = vmul.f32 %v1763_v37, %v787_v45  ;;  %v794_v51 = vmul.f32 %v1765_v46, %v782_v41  ;;  %vm800_vm3 = vweird.f32 %v1765_v46 }
 0x7fa   :  { %vm801_vm5 = vmor %vm799_vm4, %vm800_vm3 }
 0x7fb   :  { %v792_v44 = vsel %vm791_vm2, %v1763_v37, %v788_v48  ;;  %v795_v56 = vmul.f32 %v1765_v46, %v794_v51 }
 0x7fc   :  { %v803_v53 = vmul.f32 %v792_v44, %v769_v20 }
 0x7fd   :  { %v796_v59 = vmul.f32 0.5, %v795_v56 }
 0x7fe   :  { %v806_v58 = vmul.f32 %v1720_v50, %v803_v53 }
 0x7ff   :  { %v797_v55 = vsub.f32 1.5, %v796_v59 }
 0x800   :  { %v2051_v60 = vadd.f32 %v1721_v57, %v806_v58  ;;  %v850_v58 = vld [vmem:[#allocation5 + $0x120] sm:$0xff] }
 0x801   :  { %v798_v61 = vmul.f32 %v1765_v46, %v797_v55 }
 0x802   :  { %1655 = vst.msk [vmem:[%s2201_s4 + $0x10] sm:$0xff] %vm52_vm0, %v2051_v60  ;;  %1657 = vmatmul.msk.f32.vlgmr.msrb.gmra.mxu2 %vm52_vm0, %v2051_v60 }
 0x803   :  { %v802_v63 = vsel %vm801_vm5, %v1765_v46, %v798_v61 }
 0x804   :  { %v804_v47 = vmul.f32 %v802_v63, %v770_v24 }
 0x806   :  { %v807_v0 = vmul.f32 %v1720_v50, %v804_v47 }
 0x808   :  { %v2060_v1 = vadd.f32 %v1721_v57, %v807_v0 }
 0x80a   :  { %1656 = vst.msk [vmem:[%s2201_s4 + $0x18] sm:$0xff] %vm52_vm0, %v2060_v1  ;;  %1658 = vmatmul.msk.f32.gmra.mxu2 %vm52_vm0, %v2060_v1 }
 0x885   :  { %v843_v3 = vpop.f32.mrf.mxu2 }
 0x886   :  { %v2069_v62 = vadd.f32 %v1722_v43, %v843_v3 }
 0x888   :  { %854 = vrot.lane.b32.xlu0 %v2069_v62, %s1847_s11 }
 0x88d   :  { %v846_v4 = vpop.f32.mrf.mxu2 }
 0x88e   :  { %v2073_v52 = vadd.f32 %v1722_v43, %v846_v4 }
 0x890   :  { %1039 = vrot.lane.b32.xlu0 %v2073_v52, %s1846_s10  ;;  %1041 = vrot.lane.b32.xlu1 %v2073_v52, %s1845_s9  ;;  %v1700_v48 = vpack.i.bf16 %v2073_v52, %v2069_v62 }
 0x891   :  { %881 = vrot.lane.b32.xlu2 %v2073_v52, %s1847_s11 }
 0x898   :  { %1011 = vrot.lane.b32.xlu1 %v2069_v62, %s1846_s10 }
 0x899   :  { %1013 = vrot.lane.b32.xlu2 %v2069_v62, %s1845_s9 }
 0x8eb   :  { %v882_v6 = vpop.permute.xlu2 %881 }
 0x8ec   :  { %1661 = vmatpush.xpose.msk.msrb.mxu3 %vm161_vm8, %v882_v6 }
 0x8ef   :  { %1662 = vmatmul.msk.f32.vlgmr.msrb.gmra.mxu3 %vm161_vm8, %v2073_v52 }
 0x8f3   :  { %v1014_v7 = vpop.permute.xlu2 %1013 }
 0x8f4   :  { %1665 = vmatpush.xpose.msk.msra.mxu1 %vm161_vm8, %v1014_v7 }
 0x8fa   :  { %v855_v8 = vpop.permute.xlu0 %854 }
 0x8fb   :  { %1659 = vmatpush.xpose.msk.msrb.mxu0 %vm161_vm8, %v855_v8 }
 0x8fe   :  { %1660 = vmatmul.msk.f32.vlgmr.msrb.gmra.mxu0 %vm161_vm8, %v2069_v62 }
 0x902   :  { %v1042_v9 = vpop.permute.xlu1 %1041  ;;  %v1040_v42 = vpop.permute.xlu0 %1039 }
 0x903   :  { %1667 = vmatpush.xpose.msk.msra.mxu2 %vm161_vm8, %v1042_v9 }
 0x906   :  { %1668 = vmatmul.msk.f32.vlgmr.msra.gmra.mxu2 %vm161_vm8, %v1040_v42 }
 0x907   :  { %1220 = vmatpush.msrb.mxu2 %v850_v58 }
 0x90a   :  { %v1012_v11 = vpop.permute.xlu1 %1011 }
 0x90b   :  { %1666 = vmatmul.msk.f32.vlgmr.msra.gmra.mxu1 %vm161_vm8, %v1012_v11 }
 0x972   :  { %v904_v12 = vpop.f32.mrf.mxu3 }
 0x973   :  { %v908_v13 = vmul.f32 0.25, %v904_v12 }
 0x975   :  { %v910_v14 = vadd.f32 %v908_v13, %v1945_v2 }
 0x977   :  { %v914_v54 = vsel %vm217_vm9, %v910_v14, -inf }
 0x978   :  { %915 = vmax.xlane.f32.xlu2 %v914_v54 }
 0x97b   :  { %v877_v15 = vpop.f32.mrf.mxu0 }
 0x97c   :  { %v907_v16 = vmul.f32 0.25, %v877_v15 }
 0x97e   :  { %v909_v17 = vadd.f32 %v907_v16, %v1947_v5 }
 0x980   :  { %v911_v18 = vsel %vm217_vm9, %v909_v17, -inf }
 0x981   :  { %912 = vmax.xlane.f32.xlu0 %v911_v18 }
 0x988   :  { %v1036_v49 = vpop.f32.mrf.mxu1 }
 0x989   :  { %v1067_v19 = vmul.f32 0.25, %v1036_v49  ;;  %v1064_v20 = vpop.f32.mrf.mxu2 }
 0x98a   :  { %v1068_v21 = vmul.f32 0.25, %v1064_v20 }
 0x98b   :  { %v1069_v22 = vadd.f32 %v1067_v19, %v1947_v5 }
 0x98c   :  { %v1070_v23 = vadd.f32 %v1068_v21, %v1945_v2 }
 0x98d   :  { %v1071_v32 = vsel %vm217_vm9, %v1069_v22, -inf }
 0x98e   :  { %1072 = vmax.xlane.f32.xlu1 %v1071_v32  ;;  %v1074_v24 = vsel %vm217_vm9, %v1070_v23, -inf }
 0x98f   :  { %1075 = vmax.xlane.f32.xlu0 %v1074_v24 }
 0x9eb   :  { %v916_v25 = vpop.xlane.xlu2 %915 }
 0x9ec   :  { %v918_v26 = vsub.f32 %v910_v14, %v916_v25 }
 0x9ee   :  { %v921_v38 = vmul.f32 1.442695, %v918_v26 }
 0x9f0   :  { %1766 = vpow2.f32 %v921_v38 }
 0x9f4   :  { %v913_v27 = vpop.xlane.xlu0 %912 }
 0x9f5   :  { %v917_v28 = vsub.f32 %v909_v17, %v913_v27 }
 0x9f6   :  { %v2103_v30 = vpop.eup %1766 }
 0x9f7   :  { %v919_v31 = vmul.f32 1.442695, %v917_v28  ;;  %v926_v5 = vsel %vm217_vm9, %v2103_v30, 0.0 }
 0x9f8   :  { %927 = vadd.xlane.f32.xlu1 %v926_v5 }
 0x9f9   :  { %1768 = vpow2.f32 %v919_v31 }
 0x9ff   :  { %v1769_v2 = vpop.eup %1768 }
 0xa00   :  { %v923_v29 = vsel %vm217_vm9, %v1769_v2, 0.0 }
 0xa01   :  { %924 = vadd.xlane.f32.xlu2 %v923_v29  ;;  %v1073_v33 = vpop.xlane.xlu1 %1072 }
 0xa02   :  { %v1077_v35 = vsub.f32 %v1069_v22, %v1073_v33  ;;  %v1076_v36 = vpop.xlane.xlu0 %1075 }
 0xa03   :  { %v1078_v37 = vsub.f32 %v1070_v23, %v1076_v36 }
 0xa04   :  { %v1079_v39 = vmul.f32 1.442695, %v1077_v35 }
 0xa05   :  { %v1081_v41 = vmul.f32 1.442695, %v1078_v37 }
 0xa06   :  { %1770 = vpow2.f32 %v1079_v39 }
 0xa07   :  { %1772 = vpow2.f32 %v1081_v41  ;;  %v849_v41 = vld [vmem:[#allocation5 + $0x118] sm:$0xff] }
 0xa08   :  { %1221 = vmatpush.msrb.mxu2 %v849_v41 }
 0xa0c   :  { %v2108_v34 = vpop.eup %1770 }
 0xa0d   :  { %v2110_v40 = vpop.eup %1772  ;;  %v1083_v45 = vsel %vm217_vm9, %v2108_v34, 0.0 }
 0xa0e   :  { %1084 = vadd.xlane.f32.xlu0 %v1083_v45  ;;  %v1086_v46 = vsel %vm217_vm9, %v2110_v40, 0.0  ;;  %v852_v45 = vld [vmem:[#allocation5 + $0x130] sm:$0xff] }
 0xa0f   :  { %1087 = vadd.xlane.f32.xlu2 %v1086_v46  ;;  %1191 = vmatpush.msrb.mxu1 %v852_v45  ;;  %v851_v46 = vld [vmem:[#allocation5 + $0x128] sm:$0xff] }
 0xa11   :  { %1701 = vrot.lane.b32.xlu1 %v1700_v48, %s1848_s1  ;;  %1192 = vmatpush.msrb.mxu1 %v851_v46 }
 0xa22   :  { %1706 = vrot.lane.b32.xlu0 %v1700_v48, %s1849_s14 }
 0xa6b   :  { %v928_v50 = vpop.xlane.xlu1 %927 }
 0xa6c   :  { %1774 = vrcp.f32 %v928_v50  ;;  %v955_v63 = vand.u32 2147483648, %v928_v50  ;;  %vm949_vm7 = vweird.f32 %v928_v50  ;;  %v953_v47 = vand.u32 2147483647, %v928_v50 }
 0xa6e   :  { %v956_v52 = vor.u32 1.1754944e-38, %v955_v63  ;;  %vm954_vm13 = vcmp.eq.f32.partialorder %v953_v47, 8.507059e+37 }
 0xa72   :  { %v1775_v51 = vpop.eup %1774 }
 0xa73   :  { %v945_v44 = vmul.f32 %v1775_v51, %v928_v50  ;;  %vm950_vm6 = vweird.f32 %v1775_v51 }
 0xa74   :  { %v925_v53 = vpop.xlane.xlu2 %924  ;;  %vm951_vm10 = vmor %vm949_vm7, %vm950_vm6 }
 0xa75   :  { %1776 = vrcp.f32 %v925_v53  ;;  %v946_v56 = vsub.f32 1.0, %v945_v44  ;;  %v940_v43 = vand.u32 2147483648, %v925_v53  ;;  %v938_v4 = vand.u32 2147483647, %v925_v53  ;;  %v1723_v44 = vld [vmem:[#allocation5 + $0x138] ss:$0 sm:$0xff] }
 0xa76   :  { %vm934_vm14 = vweird.f32 %v925_v53 }
 0xa77   :  { %v947_v57 = vmul.f32 %v1775_v51, %v946_v56  ;;  %v941_v9 = vor.u32 1.1754944e-38, %v940_v43  ;;  %vm939_vm1 = vcmp.eq.f32.partialorder %v938_v4, 8.507059e+37 }
 0xa79   :  { %v948_v55 = vadd.f32 %v1775_v51, %v947_v57 }
 0xa7b   :  { %v1777_v59 = vpop.eup %1776  ;;  %v952_v3 = vsel %vm951_vm10, %v1775_v51, %v948_v55 }
 0xa7c   :  { %v930_v61 = vmul.f32 %v1777_v59, %v925_v53  ;;  %vm935_vm11 = vweird.f32 %v1777_v59  ;;  %v957_v8 = vsel %vm954_vm13, %v956_v52, %v952_v3 }
 0xa7d   :  { %vm936_vm15 = vmor %vm934_vm14, %vm935_vm11  ;;  %v958_v15 = vmul.f32 %v2103_v30, %v957_v8 }
 0xa7e   :  { %v931_v0 = vsub.f32 1.0, %v930_v61 }
 0xa80   :  { %v932_v62 = vmul.f32 %v1777_v59, %v931_v0 }
 0xa81   :  { %v1085_v7 = vpop.xlane.xlu0 %1084 }
 0xa82   :  { %v933_v6 = vadd.f32 %v1777_v59, %v932_v62  ;;  %1778 = vrcp.f32 %v1085_v7  ;;  %v1088_v42 = vpop.xlane.xlu2 %1087  ;;  %v1100_v23 = vand.u32 2147483648, %v1085_v7  ;;  %v1098_v24 = vand.u32 2147483647, %v1085_v7 }
 0xa83   :  { %v1702_v12 = vpop.permute.xlu1 %1701  ;;  %1780 = vrcp.f32 %v1088_v42  ;;  %v1115_v32 = vand.u32 2147483648, %v1088_v42  ;;  %v1113_v26 = vand.u32 2147483647, %v1088_v42  ;;  %vm1094_vm4 = vweird.f32 %v1085_v7 }
 0xa84   :  { %v937_v11 = vsel %vm936_vm15, %v1777_v59, %v933_v6  ;;  %v1704_v14 = vunpack.i.h.bf16 %v1702_v12  ;;  %v1703_v54 = vunpack.i.l.bf16 %v1702_v12  ;;  %vm1109_vm6 = vweird.f32 %v1088_v42  ;;  %v1288_v12 = vld [vmem:[#allocation5 + $0x158] sm:$0xff] }
 0xa85   :  { %v942_v13 = vsel %vm939_vm1, %v941_v9, %v937_v11  ;;  %v1101_v30 = vor.u32 1.1754944e-38, %v1100_v23  ;;  %v1116_v31 = vor.u32 1.1754944e-38, %v1115_v32  ;;  %vm1099_vm10 = vcmp.eq.f32.partialorder %v1098_v24, 8.507059e+37  ;;  %v1289_v11 = vld [vmem:[#allocation5 + $0x160] sm:$0xff] }
 0xa86   :  { %v943_v16 = vmul.f32 %v1769_v2, %v942_v13  ;;  %1006 = vmatpush.msra.mxu3 %v1704_v14  ;;  %980 = vmatpush.msra.mxu0 %v1703_v54  ;;  %vm1114_vm11 = vcmp.eq.f32.partialorder %v1113_v26, 8.507059e+37  ;;  %v1287_v13 = vld [vmem:[#allocation5 + $0x150] sm:$0xff] }
 0xa87   :  { %1664 = vmatmul.msk.f32.vlgmr.msra.gmra.mxu3 %vm217_vm9, %v958_v15 }
 0xa88   :  { %v1779_v17 = vpop.eup %1778  ;;  %1663 = vmatmul.msk.f32.vlgmr.msra.gmra.mxu0 %vm217_vm9, %v943_v16 }
 0xa89   :  { %v1781_v18 = vpop.eup %1780  ;;  %v1090_v49 = vmul.f32 %v1779_v17, %v1085_v7  ;;  %vm1095_vm2 = vweird.f32 %v1779_v17 }
 0xa8a   :  { %v1105_v19 = vmul.f32 %v1781_v18, %v1088_v42  ;;  %vm1110_vm3 = vweird.f32 %v1781_v18  ;;  %vm1096_vm5 = vmor %vm1094_vm4, %vm1095_vm2 }
 0xa8b   :  { %v1091_v20 = vsub.f32 1.0, %v1090_v49  ;;  %vm1111_vm7 = vmor %vm1109_vm6, %vm1110_vm3 }
 0xa8c   :  { %v1106_v21 = vsub.f32 1.0, %v1105_v19 }
 0xa8d   :  { %v1092_v22 = vmul.f32 %v1779_v17, %v1091_v20 }
 0xa8e   :  { %v1107_v25 = vmul.f32 %v1781_v18, %v1106_v21 }
 0xa8f   :  { %v1093_v38 = vadd.f32 %v1779_v17, %v1092_v22 }
 0xa90   :  { %v1108_v27 = vadd.f32 %v1781_v18, %v1107_v25  ;;  %v1724_v25 = vld [vmem:[#allocation5 + $0x140] ss:$0 sm:$0xff] }
 0xa91   :  { %v1097_v28 = vsel %vm1096_vm5, %v1779_v17, %v1093_v38 }
 0xa92   :  { %v1112_v5 = vsel %vm1111_vm7, %v1781_v18, %v1108_v27  ;;  %v1102_v2 = vsel %vm1099_vm10, %v1101_v30, %v1097_v28  ;;  %v1725_v28 = vld [vmem:[#allocation5 + $0x148] ss:$0 sm:$0xff] }
 0xa93   :  { %v1117_v29 = vsel %vm1114_vm11, %v1116_v31, %v1112_v5  ;;  %v1103_v37 = vmul.f32 %v2108_v34, %v1102_v2 }
 0xa94   :  { %v1707_v33 = vpop.permute.xlu0 %1706  ;;  %v1118_v39 = vmul.f32 %v2110_v40, %v1117_v29 }
 0xa95   :  { %v1709_v35 = vunpack.i.h.bf16 %v1707_v33  ;;  %v1708_v36 = vunpack.i.l.bf16 %v1707_v33 }
 0xa97   :  { %1140 = vmatpush.msrb.mxu0 %v1708_v36  ;;  %1166 = vmatpush.msrb.mxu3 %v1709_v35 }
 0xa98   :  { %1669 = vmatmul.msk.f32.vlgmr.msrb.gmra.mxu0 %vm217_vm9, %v1103_v37  ;;  %1670 = vmatmul.msk.f32.vlgmr.msrb.gmra.mxu3 %vm217_vm9, %v1118_v39  ;;  %v1726_v39 = vld [vmem:[#allocation5 + $0x170] ss:$0 sm:$0xff] }
 0xb05   :  { %v982_v48 = vpop.f32.mrf.mxu0 }
 0xb06   :  { %1673 = vmatmul.msk.f32.vlgmr.msrb.gmra.mxu2 %vm161_vm8, %v982_v48 }
 0xb0a   :  { %v1008_v50 = vpop.f32.mrf.mxu3 }
 0xb0e   :  { %1674 = vmatmul.msk.f32.gmra.mxu2 %vm161_vm8, %v1008_v50 }
 0xb15   :  { %v1142_v34 = vpop.f32.mrf.mxu0 }
 0xb16   :  { %1671 = vmatmul.msk.f32.vlgmr.msrb.gmra.mxu1 %vm161_vm8, %v1142_v34 }
 0xb1b   :  { %v1168_v40 = vpop.f32.mrf.mxu3 }
 0xb1e   :  { %1672 = vmatmul.msk.f32.gmra.mxu1 %vm161_vm8, %v1168_v40  ;;  %v1417_v40 = vld [vmem:[#allocation5 + $0x1b0] sm:$0xff] }
 0xb1f   :  { %1434 = vmatpush.msra.mxu3 %v1417_v40 }
 0xb89   :  { %v1223_v51 = vpop.f32.mrf.mxu2 }
 0xb91   :  { %v1226_v55 = vpop.f32.mrf.mxu2 }
 0xb93   :  { %v1194_v53 = vpop.f32.mrf.mxu1 }
 0xb94   :  { %v1224_v56 = vadd.f32 %v1223_v51, %v1194_v53 }
 0xb96   :  { %v1231_v57 = vadd.f32 %v1723_v44, %v1224_v56  ;;  %v1416_v56 = vld [vmem:[#allocation5 + $0x1a8] sm:$0xff] }
 0xb97   :  { %1435 = vmatpush.msra.mxu3 %v1416_v56 }
 0xb98   :  { %v1233_v58 = vadd.f32 %v1231_v57, %v2051_v60 }
 0xb9a   :  { %v1237_v59 = vsel %vm52_vm0, %v1233_v58, 0.0 }
 0xb9b   :  { %1238 = vadd.xlane.f32.xlu2 %v1237_v59  ;;  %v1197_v61 = vpop.f32.mrf.mxu1 }
 0xb9c   :  { %v1227_v63 = vadd.f32 %v1226_v55, %v1197_v61  ;;  %v1415_v55 = vld [vmem:[#allocation5 + $0x1a0] sm:$0xff] }
 0xb9d   :  { %1436 = vmatpush.msra.mxu3 %v1415_v55 }
 0xb9e   :  { %v1232_v47 = vadd.f32 %v1723_v44, %v1227_v63 }
 0xba0   :  { %v1234_v0 = vadd.f32 %v1232_v47, %v2060_v1  ;;  %v1290_v1 = vld [vmem:[#allocation5 + $0x168] sm:$0xff] }
 0xba1   :  { %1311 = vmatpush.msra.mxu0 %v1290_v1 }
 0xba2   :  { %v1240_v43 = vsel %vm52_vm0, %v1234_v0, 0.0 }
 0xba3   :  { %1241 = vadd.xlane.f32.xlu2 %v1240_v43  ;;  %1312 = vmatpush.msra.mxu0 %v1289_v11  ;;  %v1411_v11 = vld [vmem:[#allocation5 + $0x180] sm:$0xff] }
 0xba5   :  { %1313 = vmatpush.msra.mxu0 %v1288_v12 }
 0xba7   :  { %1314 = vmatpush.msra.mxu0 %v1287_v13 }
 0xc0e   :  { %v1239_v3 = vpop.xlane.xlu2 %1238 }
 0xc0f   :  { %v1243_v62 = vmul.f32 %v1239_v3, %v1896_v10 }
 0xc11   :  { %v1245_v4 = vsub.f32 %v1233_v58, %v1243_v62 }
 0xc13   :  { %v1247_v52 = vmul.f32 %v1245_v4, %v1245_v4 }
 0xc15   :  { %v1249_v6 = vsel %vm52_vm0, %v1247_v52, 0.0 }
 0xc16   :  { %1250 = vadd.xlane.f32.xlu2 %v1249_v6  ;;  %v1242_v60 = vpop.xlane.xlu2 %1241 }
 0xc17   :  { %v1244_v7 = vmul.f32 %v1242_v60, %v1896_v10 }
 0xc19   :  { %v1246_v8 = vsub.f32 %v1234_v0, %v1244_v7  ;;  %v1414_v0 = vld [vmem:[#allocation5 + $0x198] sm:$0xff]  ;;  %v1412_v7 = vld [vmem:[#allocation5 + $0x188] sm:$0xff] }
 0xc1a   :  { %1437 = vmatpush.msra.mxu3 %v1414_v0 }
 0xc1b   :  { %v1248_v9 = vmul.f32 %v1246_v8, %v1246_v8 }
 0xc1d   :  { %v1252_v42 = vsel %vm52_vm0, %v1248_v9, 0.0 }
 0xc1e   :  { %1253 = vadd.xlane.f32.xlu0 %v1252_v42 }
 0xc89   :  { %v1251_v14 = vpop.xlane.xlu2 %1250 }
 0xc8a   :  { %v1255_v54 = vmul.f32 %v1251_v14, %v1896_v10 }
 0xc8c   :  { %v1257_v15 = vadd.f32 1e-05, %v1255_v54  ;;  %v1410_v54 = vld [vmem:[#allocation5 + $0x178] sm:$0xff] }
 0xc8e   :  { %1782 = vrsqrt.f32 %v1257_v15  ;;  %vm1265_vm9 = vweird.f32 %v1257_v15 }
 0xc91   :  { %v1254_v16 = vpop.xlane.xlu0 %1253 }
 0xc92   :  { %v1256_v17 = vmul.f32 %v1254_v16, %v1896_v10 }
 0xc94   :  { %v1783_v18 = vpop.eup %1782  ;;  %v1258_v49 = vadd.f32 1e-05, %v1256_v17 }
 0xc95   :  { %v1260_v19 = vmul.f32 %v1783_v18, %v1257_v15  ;;  %vm1266_vm8 = vweird.f32 %v1783_v18 }
 0xc96   :  { %1784 = vrsqrt.f32 %v1258_v49  ;;  %vm1267_vm13 = vmor %vm1265_vm9, %vm1266_vm8  ;;  %vm1275_vm15 = vweird.f32 %v1258_v49 }
 0xc97   :  { %v1261_v20 = vmul.f32 %v1783_v18, %v1260_v19 }
 0xc99   :  { %v1262_v21 = vmul.f32 0.5, %v1261_v20 }
 0xc9b   :  { %v1263_v22 = vsub.f32 1.5, %v1262_v21 }
 0xc9c   :  { %v1785_v23 = vpop.eup %1784 }
 0xc9d   :  { %v1264_v32 = vmul.f32 %v1783_v18, %v1263_v22  ;;  %v1270_v24 = vmul.f32 %v1785_v23, %v1258_v49  ;;  %vm1276_vm14 = vweird.f32 %v1785_v23 }
 0xc9e   :  { %vm1277_vm1 = vmor %vm1275_vm15, %vm1276_vm14 }
 0xc9f   :  { %v1268_v26 = vsel %vm1267_vm13, %v1783_v18, %v1264_v32  ;;  %v1271_v38 = vmul.f32 %v1785_v23, %v1270_v24 }
 0xca0   :  { %v1279_v27 = vmul.f32 %v1268_v26, %v1245_v4  ;;  %v1413_v4 = vld [vmem:[#allocation5 + $0x190] sm:$0xff] }
 0xca1   :  { %v1272_v30 = vmul.f32 0.5, %v1271_v38  ;;  %1438 = vmatpush.msra.mxu3 %v1413_v4 }
 0xca2   :  { %v1282_v31 = vmul.f32 %v1724_v25, %v1279_v27 }
 0xca3   :  { %v1273_v5 = vsub.f32 1.5, %v1272_v30  ;;  %1439 = vmatpush.msra.mxu3 %v1412_v7 }
 0xca4   :  { %v2141_v2 = vadd.f32 %v1725_v28, %v1282_v31 }
 0xca5   :  { %v1274_v29 = vmul.f32 %v1785_v23, %v1273_v5  ;;  %1440 = vmatpush.msra.mxu3 %v1411_v11 }
 0xca6   :  { %1675 = vmatmul.msk.f32.vlgmr.msra.gmra.mxu0 %vm52_vm0, %v2141_v2 }
 0xca7   :  { %v1278_v33 = vsel %vm1277_vm1, %v1785_v23, %v1274_v29  ;;  %1441 = vmatpush.msra.mxu3 %v1410_v54  ;;  %vm1509_vm1 = vcmask 1040384  }
 0xca8   :  { %v1280_v35 = vmul.f32 %v1278_v33, %v1246_v8 }
 0xcaa   :  { %v1283_v36 = vmul.f32 %v1724_v25, %v1280_v35 }
 0xcac   :  { %v2145_v37 = vadd.f32 %v1725_v28, %v1283_v36 }
 0xcae   :  { %1676 = vmatmul.msk.f32.gmra.mxu0 %vm52_vm0, %v2145_v37 }
 0xd23   :  { %v1316_v41 = vpop.f32.mrf.mxu0 }
 0xd24   :  { %v2149_v45 = vadd.f32 %v1726_v39, %v1316_v41 }
 0xd26   :  { %v2152_v46 = vmul.f32 0.70710677, %v2149_v45 }
 0xd28   :  { %v1326_v48 = vmul.f32 %v2152_v46, %v2152_v46 }
 0xd2a   :  { %v1327_v50 = vmin.f32 %v1326_v48, 16.0 }
 0xd2b   :  { %v1319_v34 = vpop.f32.mrf.mxu0 }
 0xd2c   :  { %v1328_v51 = vmul.f32 2.1237322e-06, %v1327_v50  ;;  %v1339_v44 = vmul.f32 3.8918573e-05, %v1327_v50  ;;  %v2156_v53 = vadd.f32 %v1726_v39, %v1319_v34 }
 0xd2e   :  { %v1329_v57 = vadd.f32 0.00028619796, %v1328_v51  ;;  %v1340_v58 = vadd.f32 0.001143296, %v1339_v44  ;;  %v2159_v59 = vmul.f32 0.70710677, %v2156_v53 }
 0xd30   :  { %v1330_v61 = vmul.f32 %v1329_v57, %v1327_v50  ;;  %v1341_v63 = vmul.f32 %v1340_v58, %v1327_v50  ;;  %v1366_v47 = vmul.f32 %v2159_v59, %v2159_v59 }
 0xd32   :  { %v1342_v43 = vadd.f32 0.014752088, %v1341_v63  ;;  %v1331_v3 = vadd.f32 0.0036580483, %v1330_v61  ;;  %v1367_v62 = vmin.f32 %v1366_v47, 16.0 }
 0xd34   :  { %v1343_v52 = vmul.f32 %v1342_v43, %v1327_v50  ;;  %v1368_v6 = vmul.f32 2.1237322e-06, %v1367_v62  ;;  %v1379_v60 = vmul.f32 3.8918573e-05, %v1367_v62  ;;  %v1332_v9 = vmul.f32 %v1331_v3, %v1327_v50 }
 0xd35   :  { %v1322_v3 = vmul.f32 0.5, %v2149_v45  ;;  %v1727_v45 = vld [vmem:[#allocation5 + $0x1b8] ss:$0 sm:$0xff] }
 0xd36   :  { %v1344_v8 = vadd.f32 0.112945676, %v1343_v52  ;;  %v1369_v42 = vadd.f32 0.00028619796, %v1368_v6  ;;  %v1380_v1 = vadd.f32 0.001143296, %v1379_v60 }
 0xd37   :  { %v1333_v16 = vadd.f32 0.05243302, %v1332_v9 }
 0xd38   :  { %v1345_v12 = vmul.f32 %v1344_v8, %v1327_v50  ;;  %v1370_v13 = vmul.f32 %v1369_v42, %v1367_v62  ;;  %v1381_v14 = vmul.f32 %v1380_v1, %v1367_v62  ;;  %v1323_v42 = vmul.f32 0.5, %v2156_v53 }
 0xd39   :  { %v1334_v21 = vmul.f32 %v1333_v16, %v1327_v50 }
 0xd3a   :  { %v1346_v15 = vadd.f32 0.4994258, %v1345_v12  ;;  %v1382_v17 = vadd.f32 0.014752088, %v1381_v14  ;;  %v1371_v49 = vadd.f32 0.0036580483, %v1370_v13 }
 0xd3b   :  { %v1335_v24 = vadd.f32 0.18741608, %v1334_v21 }
 0xd3c   :  { %v1347_v18 = vmul.f32 %v1346_v15, %v1327_v50  ;;  %v1383_v19 = vmul.f32 %v1382_v17, %v1367_v62  ;;  %v1372_v23 = vmul.f32 %v1371_v49, %v1367_v62 }
 0xd3d   :  { %v1336_v28 = vmul.f32 %v1335_v24, %v1327_v50 }
 0xd3e   :  { %v1348_v20 = vadd.f32 1.0, %v1347_v18  ;;  %v1384_v22 = vadd.f32 0.112945676, %v1383_v19  ;;  %v1373_v26 = vadd.f32 0.05243302, %v1372_v23 }
 0xd3f   :  { %v1337_v35 = vadd.f32 1.1283791, %v1336_v28  ;;  %v1511_v28 = vld [vmem:[#allocation5 + $0x1d0] sm:$0xff] }
 0xd40   :  { %1786 = vrcp.f32 %v1348_v20  ;;  %v1385_v32 = vmul.f32 %v1384_v22, %v1367_v62  ;;  %v1374_v5 = vmul.f32 %v1373_v26, %v1367_v62  ;;  %v1360_v33 = vand.u32 2147483648, %v1348_v20  ;;  %v1513_v26 = vld [vmem:[#allocation5 + $0x1e0] sm:$0xff] }
 0xd41   :  { %v1358_v39 = vand.u32 2147483647, %v1348_v20  ;;  %vm1354_vm3 = vweird.f32 %v1348_v20  ;;  %v1338_v51 = vmul.f32 %v1337_v35, %v2152_v46 }
 0xd42   :  { %v1386_v25 = vadd.f32 0.4994258, %v1385_v32  ;;  %v1375_v41 = vadd.f32 0.18741608, %v1374_v5  ;;  %v1361_v34 = vor.u32 1.1754944e-38, %v1360_v33 }
 0xd43   :  { %vm1359_vm5 = vcmp.eq.f32.partialorder %v1358_v39, 8.507059e+37 }
 0xd44   :  { %v1387_v38 = vmul.f32 %v1386_v25, %v1367_v62  ;;  %v1376_v56 = vmul.f32 %v1375_v41, %v1367_v62 }
 0xd46   :  { %v1787_v27 = vpop.eup %1786  ;;  %v1388_v31 = vadd.f32 1.0, %v1387_v38  ;;  %v1377_v47 = vadd.f32 1.1283791, %v1376_v56  ;;  %v1512_v38 = vld [vmem:[#allocation5 + $0x1d8] sm:$0xff]  ;;  %v1729_v56 = vld [vmem:[#allocation5 + $0x1c8] ss:$0 sm:$0xff] }
 0xd47   :  { %v1350_v30 = vmul.f32 %v1787_v27, %v1348_v20  ;;  %vm1355_vm2 = vweird.f32 %v1787_v27 }
 0xd48   :  { %1788 = vrcp.f32 %v1388_v31  ;;  %vm1356_vm4 = vmor %vm1354_vm3, %vm1355_vm2  ;;  %v1400_v63 = vand.u32 2147483648, %v1388_v31  ;;  %v1398_v43 = vand.u32 2147483647, %v1388_v31  ;;  %vm1394_vm7 = vweird.f32 %v1388_v31 }
 0xd49   :  { %v1351_v29 = vsub.f32 1.0, %v1350_v30  ;;  %v1378_v60 = vmul.f32 %v1377_v47, %v2159_v59  ;;  %vm1570_vm2 = vcmask 1041408  }
 0xd4a   :  { %v1401_v46 = vor.u32 1.1754944e-38, %v1400_v63  ;;  %vm1399_vm11 = vcmp.eq.f32.partialorder %v1398_v43, 8.507059e+37 }
 0xd4b   :  { %v1352_v36 = vmul.f32 %v1787_v27, %v1351_v29 }
 0xd4d   :  { %v1353_v48 = vadd.f32 %v1787_v27, %v1352_v36 }
 0xd4e   :  { %v1789_v40 = vpop.eup %1788 }
 0xd4f   :  { %v1357_v44 = vsel %vm1356_vm4, %v1787_v27, %v1353_v48  ;;  %v1390_v57 = vmul.f32 %v1789_v40, %v1388_v31  ;;  %vm1395_vm6 = vweird.f32 %v1789_v40  ;;  %vm1602_vm4 = vcmask 1041409  }
 0xd50   :  { %v1362_v50 = vsel %vm1359_vm5, %v1361_v34, %v1357_v44  ;;  %vm1396_vm10 = vmor %vm1394_vm7, %vm1395_vm6  ;;  %vm1618_vm5 = vcmask 1042432  }
 0xd51   :  { %v1363_v58 = vmul.f32 %v1362_v50, %v1338_v51  ;;  %v1391_v55 = vsub.f32 1.0, %v1390_v57 }
 0xd53   :  { %v1677_v61 = vclamps-f32 %v1363_v58, 1.0  ;;  %v1392_v0 = vmul.f32 %v1789_v40, %v1391_v55 }
 0xd55   :  { %v1406_v4 = vadd.f32 1.0, %v1677_v61  ;;  %v1393_v52 = vadd.f32 %v1789_v40, %v1392_v0 }
 0xd57   :  { %v1408_v6 = vmul.f32 %v1406_v4, %v1322_v3  ;;  %v1397_v62 = vsel %vm1396_vm10, %v1789_v40, %v1393_v52  ;;  %v1728_v40 = vld [vmem:[#allocation5 + $0x1c0] ss:$0 sm:$0xff]  ;;  %v1544_v52 = vld [vmem:[#allocation5 + $0x210] sm:$0xff] }
 0xd58   :  { %v1402_v7 = vsel %vm1399_vm11, %v1401_v46, %v1397_v62  ;;  %1562 = vmatpush.msra.mxu2 %v1544_v52  ;;  %v1542_v46 = vld [vmem:[#allocation5 + $0x200] sm:$0xff]  ;;  %v1730_v62 = vld [vmem:[#allocation5 + $0x1f0] ss:$0 sm:$0xff] }
 0xd59   :  { %1679 = vmatmul.msk.f32.vlgmr.msra.gmra.mxu3 %vm727_vm12, %v1408_v6  ;;  %v1403_v8 = vmul.f32 %v1402_v7, %v1378_v60  ;;  %v1543_v6 = vld [vmem:[#allocation5 + $0x208] sm:$0xff]  ;;  %v1541_v60 = vld [vmem:[#allocation5 + $0x1f8] sm:$0xff] }
 0xd5a   :  { %1563 = vmatpush.msra.mxu2 %v1543_v6 }
 0xd5b   :  { %v1678_v9 = vclamps-f32 %v1403_v8, 1.0 }
 0xd5c   :  { %1564 = vmatpush.msra.mxu2 %v1542_v46 }
 0xd5d   :  { %v1407_v1 = vadd.f32 1.0, %v1678_v9 }
 0xd5e   :  { %1565 = vmatpush.msra.mxu2 %v1541_v60 }
 0xd5f   :  { %v1409_v11 = vmul.f32 %v1407_v1, %v1323_v42  ;;  %v1731_v42 = vld [vmem:[#allocation5 + $0x218] ss:$0 sm:$0xff] }
 0xd61   :  { %1680 = vmatmul.msk.f32.gmra.mxu3 %vm727_vm12, %v1409_v11 }
 0xddc   :  { %v1443_v12 = vpop.f32.mrf.mxu3 }
 0xddd   :  { %v1444_v13 = vadd.f32 %v1727_v45, %v1443_v12 }
 0xddf   :  { %v1449_v14 = vadd.f32 %v1444_v13, %v2141_v2 }
 0xde1   :  { %v1453_v59 = vsel %vm52_vm0, %v1449_v14, 0.0 }
 0xde2   :  { %1454 = vadd.xlane.f32.xlu2 %v1453_v59 }
 0xde4   :  { %v1446_v54 = vpop.f32.mrf.mxu3 }
 0xde5   :  { %v1447_v15 = vadd.f32 %v1727_v45, %v1446_v54 }
 0xde7   :  { %v1450_v16 = vadd.f32 %v1447_v15, %v2145_v37  ;;  %v1514_v37 = vld [vmem:[#allocation5 + $0x1e8] sm:$0xff] }
 0xde8   :  { %1532 = vmatpush.msra.mxu1 %v1514_v37 }
 0xde9   :  { %v1456_v17 = vsel %vm52_vm0, %v1450_v16, 0.0 }
 0xdea   :  { %1457 = vadd.xlane.f32.xlu1 %v1456_v17  ;;  %1533 = vmatpush.msra.mxu1 %v1513_v26  ;;  %v1851_v26 = vmov 0  }
 0xdeb   :  { %1710 = vset.pattern.permute.xlu1 %v1851_v26  ;;  %1711 = vset.pattern.permute.xlu0 %v1851_v26 }
 0xdec   :  { %1534 = vmatpush.msra.mxu1 %v1512_v38 }
 0xdee   :  { %1535 = vmatpush.msra.mxu1 %v1511_v28 }
 0xe55   :  { %v1455_v53 = vpop.xlane.xlu2 %1454 }
 0xe56   :  { %v1459_v19 = vmul.f32 %v1455_v53, %v1896_v10 }
 0xe58   :  { %v1461_v22 = vsub.f32 %v1449_v14, %v1459_v19 }
 0xe5a   :  { %v1463_v23 = vmul.f32 %v1461_v22, %v1461_v22 }
 0xe5c   :  { %v1465_v32 = vsel %vm52_vm0, %v1463_v23, 0.0 }
 0xe5d   :  { %v1458_v18 = vpop.xlane.xlu1 %1457 }
 0xe5e   :  { %v1460_v49 = vmul.f32 %v1458_v18, %v1896_v10  ;;  %v1587_v18 = vstv %s1586_s23 }
 0xe60   :  { %v1462_v20 = vsub.f32 %v1450_v16, %v1460_v49  ;;  %v1584_v16 = vlaneseq }
 0xe62   :  { %v1464_v21 = vmul.f32 %v1462_v20, %v1462_v20  ;;  %v1585_v17 = vand.u32 127, %v1584_v16 }
 0xe64   :  { %v1468_v2 = vsel %vm52_vm0, %v1464_v21, 0.0  ;;  %vm1588_vm3 = vcmp.eq.s32.totalorder %v1585_v17, %v1587_v18  ;;  %v1850_v21 = vmov 0.0  }
 0xe65   :  { %1469 = vadd.xlane.f32.xlu2 %v1468_v2  ;;  %v1685_v2 = vsel %vm1588_vm3, 1.0, %v1850_v21 }
 0xe6d   :  { %1466 = vadd.xlane.f32.xlu2 %v1465_v32 }
 0xed8   :  { %v1470_v24 = vpop.xlane.xlu2 %1469 }
 0xed9   :  { %v1472_v25 = vmul.f32 %v1470_v24, %v1896_v10 }
 0xedb   :  { %v1474_v27 = vadd.f32 1e-05, %v1472_v25 }
 0xedd   :  { %1790 = vrsqrt.f32 %v1474_v27  ;;  %vm1491_vm8 = vweird.f32 %v1474_v27 }
 0xee0   :  { %v1467_v30 = vpop.xlane.xlu2 %1466 }
 0xee1   :  { %v1471_v31 = vmul.f32 %v1467_v30, %v1896_v10 }
 0xee3   :  { %v1791_v5 = vpop.eup %1790  ;;  %v1473_v29 = vadd.f32 1e-05, %v1471_v31 }
 0xee4   :  { %v1486_v33 = vmul.f32 %v1791_v5, %v1474_v27  ;;  %vm1492_vm12 = vweird.f32 %v1791_v5 }
 0xee5   :  { %1792 = vrsqrt.f32 %v1473_v29  ;;  %vm1493_vm9 = vmor %vm1491_vm8, %vm1492_vm12  ;;  %vm1481_vm14 = vweird.f32 %v1473_v29 }
 0xee6   :  { %v1487_v35 = vmul.f32 %v1791_v5, %v1486_v33 }
 0xee8   :  { %v1488_v36 = vmul.f32 0.5, %v1487_v35 }
 0xeea   :  { %v1489_v39 = vsub.f32 1.5, %v1488_v36 }
 0xeeb   :  { %v1793_v41 = vpop.eup %1792 }
 0xeec   :  { %v1490_v48 = vmul.f32 %v1791_v5, %v1489_v39  ;;  %v1476_v34 = vmul.f32 %v1793_v41, %v1473_v29  ;;  %vm1482_vm13 = vweird.f32 %v1793_v41 }
 0xeed   :  { %vm1483_vm15 = vmor %vm1481_vm14, %vm1482_vm13 }
 0xeee   :  { %v1494_v51 = vsel %vm1493_vm9, %v1791_v5, %v1490_v48  ;;  %v1477_v44 = vmul.f32 %v1793_v41, %v1476_v34 }
 0xeef   :  { %v1496_v50 = vmul.f32 %v1494_v51, %v1462_v20 }
 0xef0   :  { %v1478_v57 = vmul.f32 0.5, %v1477_v44 }
 0xef1   :  { %v1499_v10 = vmul.f32 %v1728_v40, %v1496_v50 }
 0xef2   :  { %v1479_v58 = vsub.f32 1.5, %v1478_v57 }
 0xef3   :  { %v1502_v55 = vadd.f32 %v1729_v56, %v1499_v10 }
 0xef4   :  { %v1480_v61 = vmul.f32 %v1793_v41, %v1479_v58 }
 0xef5   :  { %1682 = vst.msk [vmem:[%s2201_s4 + $0x28] sm:$0xff] %vm52_vm0, %v1502_v55  ;;  %v1507_v3 = vrot.slane %v1502_v55, 7 }
 0xef6   :  { %v1484_v63 = vsel %vm1483_vm15, %v1793_v41, %v1480_v61 }
 0xef7   :  { %v1495_v47 = vmul.f32 %v1484_v63, %v1461_v22 }
 0xef9   :  { %v1498_v0 = vmul.f32 %v1728_v40, %v1495_v47 }
 0xefb   :  { %v1501_v43 = vadd.f32 %v1729_v56, %v1498_v0 }
 0xefd   :  { %1681 = vst.msk [vmem:[%s2201_s4 + $0x20] sm:$0xff] %vm52_vm0, %v1501_v43  ;;  %v1510_v4 = vsel %vm1509_vm1, %v1501_v43, %v1507_v3  ;;  %s1686_s4 = sld [smem:[#allocation2 + $0x1]] }
 0xefe   :  { %1683 = vmatmul.msk.f32.vlgmr.msra.gmra.mxu1 %vm52_vm0, %v1510_v4 }
 0xf03   :  { %v1597_v53 = vstv %s1686_s4 }
 0xf7b   :  { %v1537_v7 = vpop.f32.mrf.mxu1 }
 0xf7c   :  { %v1538_v8 = vadd.f32 %v1730_v62, %v1537_v7 }
 0xf7e   :  { %1794 = vtanh.f32 %v1538_v8 }
 0xf84   :  { %v1795_v9 = vpop.eup %1794 }
 0xf85   :  { %1684 = vmatmul.msk.f32.vlgmr.msra.gmra.mxu2 %vm52_vm0, %v1795_v9  ;;  %vm1598_vm0 = vcmp.eq.s32.totalorder %v1585_v17, %v1597_v53 }
 0xf86   :  { %v1687_v22 = vsel %vm1598_vm0, 1.0, %v1850_v21 }
0x1008   :  { %v1567_v1 = vpop.f32.mrf.mxu2 }
0x1009   :  { %v1568_v11 = vadd.f32 %v1731_v42, %v1567_v1 }
0x100b   :  { %v1571_v45 = vsel %vm1570_vm2, %v1568_v11, -inf }
0x100c   :  { %1572 = vmax.xlane.f32.xlu2 %v1571_v45 }
0x107f   :  { %v1573_v12 = vpop.xlane.xlu2 %1572 }
0x1080   :  { %v1574_v13 = vsub.f32 %v1568_v11, %v1573_v12 }
0x1082   :  { %v1575_v14 = vmul.f32 1.442695, %v1574_v13 }
0x1084   :  { %1796 = vpow2.f32 %v1575_v14 }
0x108a   :  { %v1797_v59 = vpop.eup %1796 }
0x108b   :  { %v1577_v54 = vsel %vm1570_vm2, %v1797_v59, 0.0 }
0x108c   :  { %1578 = vadd.xlane.f32.xlu2 %v1577_v54 }
0x10ff   :  { %v1579_v15 = vpop.xlane.xlu2 %1578 }
0x1100   :  { %1798 = vlog2.f32 %v1579_v15 }
0x1106   :  { %v1799_v49 = vpop.eup %1798 }
0x1107   :  { %v1581_v19 = vmul.f32 0.6931472, %v1799_v49 }
0x1109   :  { %v1582_v20 = vadd.f32 %v1581_v19, %v1573_v12 }
0x110b   :  { %v1583_v23 = vsub.f32 %v1568_v11, %v1582_v20 }
0x110d   :  { %v1601_v32 = vmul.f32 %v1687_v22, %v1583_v23  ;;  %v1591_v37 = vmul.f32 %v1685_v2, %v1583_v23 }
0x110f   :  { %v1603_v24 = vsel %vm1602_vm4, %v1601_v32, 0.0  ;;  %v1592_v25 = vsel %vm1509_vm1, %v1591_v37, 0.0 }
0x1110   :  { %1604 = vadd.xlane.f32.xlu2 %v1603_v24  ;;  %1593 = vadd.xlane.f32.xlu0 %v1592_v25 }
0x1183   :  { %v1605_v38 = vpop.xlane.xlu2 %1604  ;;  %v1594_v27 = vpop.xlane.xlu0 %1593 }
0x1184   :  { %v1607_v28 = vrot.slane %v1605_v38, 1  ;;  %v1595_v30 = vsub.f32 0.0, %v1594_v27 }
0x1186   :  { %v1609_v31 = vsub.f32 %v1595_v30, %v1607_v28 }
0x1188   :  { %v1610_v5 = vmul.f32 0.5, %v1609_v31 }
0x118a   :  { %1613 = vperm.xlu1 %1710, %v1610_v5  }
0x11fc   :  { %v1614_v29 = vpop.permute.xlu1 %1613 }
0x11fd   :  { %v1615_v33 = vrot.slane %v1614_v29, 6 }
0x11ff   :  { %v1617_v35 = vsel %vm1570_vm2, %v1568_v11, %v1615_v33 }
0x1200   :  { %v1619_v36 = vsel %vm1618_vm5, %v1617_v35, 0.0 }
0x1201   :  { %1620 = vst [vmem:[%s2202_s5] sm:$0xff] %v1619_v36 }
0x1202   :  { %1629 = vsyncpa [#allocation3], 1 }
0x1203   :  { %1630 = vsyncpa [#allocation4], 1 }

</bundles_post_ra>
